<compile_context>
chip_gen: v6e
topology: v6e:2x2x1
jax: 0.10.0
libtpu: 0.0.40
codegen_flags: <defaults>
</compile_context>

<pallas_src>
import functools

import jax
import jax.numpy as jnp
from jax import lax
from jax.experimental import pallas as pl
from jax.experimental.pallas import tpu as pltpu

# ----------------------------- configuration -------------------------------
D_MODEL = 32
EXPAND = 2
D_INNER = EXPAND * D_MODEL            # 64
D_STATE = 16
DT_RANK = max(1, D_MODEL // 16)       # 2
D_CONV = 4
SEQ_LEN = 10
LABEL_LEN = 3
LABEL_DIM = 2
EPS = 1e-5
BATCH = 2


# ----------------------------- small math helpers --------------------------
def _silu(x):
    return x * (1.0 / (1.0 + jnp.exp(-x)))


def _softplus(x):
    return jnp.maximum(x, 0.0) + jnp.log(1.0 + jnp.exp(-jnp.abs(x)))


def _rmsnorm(x, w):
    return x * lax.rsqrt(jnp.mean(x * x, axis=-1, keepdims=True) + EPS) * w


# ----------------------------- the Pallas kernel ----------------------------
def _make_kernel(batch):
    bl = batch * SEQ_LEN
    first_out_t = SEQ_LEN - LABEL_LEN

    def kernel(
        x_ref,        # (B*L, d_model)   whole batch, time stacked on sublanes
        norms_ref,    # (2, d_model)     [norm1_w ; normf_w]
        win_xz_ref,   # (d_model, 2*d_inner)  fused in_proj  [x | z]
        conv_w_ref,   # (d_conv, d_inner)
        rows64_ref,   # (3, d_inner)     [conv_b ; dt_bias ; D]
        wx_all_ref,   # (d_inner, 2*d_state + d_inner)  [x_B | x_C | x_dt@dt_proj]
        a_neg_ref,    # (d_state, d_inner)   -exp(A_log)
        wout_ref,     # (d_inner, d_model)
        whead_ref,    # (d_model, label_dim)
        bhead_ref,    # (1, label_dim)
        out_ref,      # (B*label_len, label_dim)
        y_scr,        # VMEM scratch (B*label_len, d_inner)
    ):
        x = x_ref[...]                                   # (bl, d_model)

        norm1_w = norms_ref[0:1, :]
        normf_w = norms_ref[1:2, :]
        conv_b = rows64_ref[0:1, :]
        bdt = rows64_ref[1:2, :]
        d_row = rows64_ref[2:3, :]

        # ---- pre-norm + fused in_proj: one (bl,32)@(32,128) MXU dot ----
        xn = _rmsnorm(x, norm1_w)
        xz = jnp.dot(xn, win_xz_ref[...], preferred_element_type=jnp.float32)
        x_in = xz[:, :D_INNER]                           # SSM branch
        z_all = xz[:, D_INNER:]                          # gate branch

        # ---- depthwise causal Conv1d along time (rows); batch-boundary masked ----
        row_ids = lax.broadcasted_iota(jnp.int32, (bl, D_INNER), 0)
        acc = jnp.broadcast_to(conv_b, (bl, D_INNER))
        for k in range(D_CONV):
            shift = D_CONV - 1 - k
            if shift == 0:
                shifted = x_in
            else:
                shifted = jnp.concatenate(
                    [jnp.zeros((shift, D_INNER), jnp.float32),
                     x_in[:bl - shift, :]], axis=0)
                if batch > 1:
                    pad = (row_ids >= SEQ_LEN) & (row_ids < SEQ_LEN + shift)
                    for b in range(2, batch):
                        pad = pad | ((row_ids >= b * SEQ_LEN)
                                     & (row_ids < b * SEQ_LEN + shift))
                    shifted = jnp.where(pad, 0.0, shifted)
            acc = acc + shifted * conv_w_ref[k:k + 1, :]
        xc = _silu(acc)                                  # (bl, d_inner)

        # ---- fused SSM-parameter projection: one (bl,64)@(64,96) MXU dot ----
        proj = jnp.dot(xc, wx_all_ref[...], preferred_element_type=jnp.float32)
        b_mat = proj[:, :D_STATE]                        # (bl, d_state)
        c_mat = proj[:, D_STATE:2 * D_STATE]             # (bl, d_state)
        delta = _softplus(proj[:, 2 * D_STATE:] + bdt)   # (bl, d_inner)

        # ---- hoist all non-recurrent terms out of the serial scan ----
        a_neg = a_neg_ref[...]                           # (d_state, d_inner)
        du = delta * xc                                  # (bl, d_inner)
        b_cols = b_mat.T                                 # (d_state, bl)
        decays = [jnp.exp(a_neg * delta[r:r + 1, :]) for r in range(bl)]
        bxs = [b_cols[:, r:r + 1] * du[r:r + 1, :] for r in range(bl)]

        # ---- selective scan: pure FMA recurrence; readout only for last 3 steps ----
        h = [jnp.zeros((D_STATE, D_INNER), jnp.float32) for _ in range(batch)]
        for t in range(SEQ_LEN):
            for b in range(batch):
                r = b * SEQ_LEN + t
                h[b] = decays[r] * h[b] + bxs[r]
                if t >= first_out_t:
                    row = b * LABEL_LEN + (t - first_out_t)
                    y_bt = (jnp.dot(c_mat[r:r + 1, :], h[b],
                                    preferred_element_type=jnp.float32)
                            + d_row * xc[r:r + 1, :])    # (1, d_inner)
                    y_scr[row:row + 1, :] = y_bt

        # ---- last LABEL_LEN tokens only: gate, out_proj, residual, norm, head ----
        z6 = jnp.concatenate(
            [z_all[b * SEQ_LEN + first_out_t:(b + 1) * SEQ_LEN, :]
             for b in range(batch)], axis=0)             # (B*3, d_inner)
        x6 = jnp.concatenate(
            [x[b * SEQ_LEN + first_out_t:(b + 1) * SEQ_LEN, :]
             for b in range(batch)], axis=0)             # (B*3, d_model)

        y6 = y_scr[...] * _silu(z6)
        res6 = x6 + jnp.dot(y6, wout_ref[...],
                            preferred_element_type=jnp.float32)
        hf6 = _rmsnorm(res6, normf_w)
        out = jnp.dot(hf6, whead_ref[...],
                      preferred_element_type=jnp.float32) + bhead_ref[...]
        out_ref[...] = out.astype(out_ref.dtype)

    return kernel


# ----------------------------- wrappers --------------------------------------
FUSED_ORDER = ["norms", "win_xz", "conv_w", "rows64", "wx_all", "a_neg",
               "wout", "whead", "bhead"]


def prepare_params(params):
    """One-time fusion of the many tiny weights into lane-dense operands."""
    weff = params["wxdt"] @ params["wdt"]                       # (64, 64)
    return {
        "norms": jnp.concatenate([params["norm1_w"], params["normf_w"]], 0),
        "win_xz": jnp.concatenate([params["win_x"], params["win_z"]], 1),
        "conv_w": params["conv_w"],
        "rows64": jnp.concatenate([params["conv_b"], params["bdt"],
                                   params["d"]], 0),
        "wx_all": jnp.concatenate([params["wxb"], params["wxc"], weff], 1),
        "a_neg": -jnp.exp(params["a_log"]),
        "wout": params["wout"],
        "whead": params["whead"],
        "bhead": params["bhead"],
    }


@jax.jit
def mamba_head_forward(x, fused):
    batch, seq, dm = x.shape
    x2d = x.reshape(batch * seq, dm)
    weights = [fused[name] for name in FUSED_ORDER]

    in_specs = [pl.BlockSpec(x2d.shape, lambda i: (0, 0))]
    in_specs += [pl.BlockSpec(w.shape, lambda i, n=w.ndim: (0,) * n)
                 for w in weights]
    out_spec = pl.BlockSpec((batch * LABEL_LEN, LABEL_DIM), lambda i: (0, 0))

    out = pl.pallas_call(
        _make_kernel(batch),
        out_shape=jax.ShapeDtypeStruct((batch * LABEL_LEN, LABEL_DIM),
                                       jnp.float32),
        grid_spec=pltpu.PrefetchScalarGridSpec(
            num_scalar_prefetch=0,
            grid=(1,),
            in_specs=in_specs,
            out_specs=out_spec,
            scratch_shapes=[pltpu.VMEM((batch * LABEL_LEN, D_INNER),
                                       jnp.float32)],
        ),
        compiler_params=pltpu.CompilerParams(
            dimension_semantics=("arbitrary",)),
    )(x2d, *weights)
    return out.reshape(batch, LABEL_LEN, LABEL_DIM)


# ----------------------------- reference (plain JAX) ------------------------
def mamba_head_reference(x, params):
    def single(x2d):
        xn = _rmsnorm(x2d, params["norm1_w"])
        x_in = xn @ params["win_x"]
        z = xn @ params["win_z"]
        acc = jnp.broadcast_to(params["conv_b"], (SEQ_LEN, D_INNER))
        for k in range(D_CONV):
            shift = D_CONV - 1 - k
            shifted = x_in if shift == 0 else jnp.concatenate(
                [jnp.zeros((shift, D_INNER), jnp.float32),
                 x_in[:SEQ_LEN - shift, :]], axis=0)
            acc = acc + shifted * params["conv_w"][k:k + 1, :]
        xc = _silu(acc)
        delta = _softplus((xc @ params["wxdt"]) @ params["wdt"] + params["bdt"])
        b_mat = xc @ params["wxb"]
        c_mat = xc @ params["wxc"]
        a_neg = -jnp.exp(params["a_log"])
        h = jnp.zeros((D_STATE, D_INNER), jnp.float32)
        ys = []
        for t in range(SEQ_LEN):
            dt_t = delta[t:t + 1, :]
            x_t = xc[t:t + 1, :]
            b_t = b_mat[t:t + 1, :].T
            c_t = c_mat[t:t + 1, :].T
            h = jnp.exp(a_neg * dt_t) * h + b_t * (dt_t * x_t)
            ys.append(jnp.sum(h * c_t, axis=0, keepdims=True)
                      + params["d"] * x_t)
        y = jnp.concatenate(ys, axis=0) * _silu(z)
        res = x2d + y @ params["wout"]
        hf = _rmsnorm(res, params["normf_w"])
        return hf[SEQ_LEN - LABEL_LEN:, :] @ params["whead"] + params["bhead"]

    return jax.vmap(single)(x)


# ----------------------------- parameter init -------------------------------
def init_params(key):
    ks = jax.random.split(key, 12)

    def nrm(k, shape, scale):
        return scale * jax.random.normal(k, shape, dtype=jnp.float32)

    a_log = jnp.log(jnp.broadcast_to(
        jnp.arange(1, D_STATE + 1, dtype=jnp.float32)[:, None],
        (D_STATE, D_INNER)))
    return {
        "norm1_w": jnp.ones((1, D_MODEL), jnp.float32),
        "win_x": nrm(ks[0], (D_MODEL, D_INNER), 0.1),
        "win_z": nrm(ks[1], (D_MODEL, D_INNER), 0.1),
        "conv_w": nrm(ks[2], (D_CONV, D_INNER), 0.2),
        "conv_b": nrm(ks[3], (1, D_INNER), 0.05),
        "wxdt": nrm(ks[4], (D_INNER, DT_RANK), 0.1),
        "wxb": nrm(ks[5], (D_INNER, D_STATE), 0.1),
        "wxc": nrm(ks[6], (D_INNER, D_STATE), 0.1),
        "wdt": nrm(ks[7], (DT_RANK, D_INNER), 0.1),
        "bdt": nrm(ks[8], (1, D_INNER), 0.05),
        "a_log": jnp.asarray(a_log),
        "d": jnp.ones((1, D_INNER), jnp.float32),
        "wout": nrm(ks[9], (D_INNER, D_MODEL), 0.1),
        "normf_w": jnp.ones((1, D_MODEL), jnp.float32),
        "whead": nrm(ks[10], (D_MODEL, LABEL_DIM), 0.1),
        "bhead": nrm(ks[11], (1, LABEL_DIM), 0.05),
    }


# ----------------------------- main ------------------------------------------
if __name__ == "__main__":
    key = jax.random.PRNGKey(0)
    pkey, xkey = jax.random.split(key)
    params = init_params(pkey)
    fused = prepare_params(params)
    x = jax.random.normal(xkey, (BATCH, SEQ_LEN, D_MODEL), dtype=jnp.float32)

    out = jax.block_until_ready(mamba_head_forward(x, fused))
    assert out.shape == (BATCH, LABEL_LEN, LABEL_DIM), out.shape

    ref = jax.block_until_ready(mamba_head_reference(x, params))
    assert jnp.allclose(out, ref, rtol=5e-3, atol=5e-3), (out, ref)

    print("KERNEL_OK")
</pallas_src>

<mosaic_0001>
module attributes {stable_mosaic.version = 11 : i64} {
  func.func @kernel(%arg0: i32, %arg1: memref<20x32xf32, #tpu.memory_space<vmem>>, %arg2: memref<2x32xf32, #tpu.memory_space<vmem>>, %arg3: memref<32x128xf32, #tpu.memory_space<vmem>>, %arg4: memref<4x64xf32, #tpu.memory_space<vmem>>, %arg5: memref<3x64xf32, #tpu.memory_space<vmem>>, %arg6: memref<64x96xf32, #tpu.memory_space<vmem>>, %arg7: memref<16x64xf32, #tpu.memory_space<vmem>>, %arg8: memref<64x32xf32, #tpu.memory_space<vmem>>, %arg9: memref<32x2xf32, #tpu.memory_space<vmem>>, %arg10: memref<1x2xf32, #tpu.memory_space<vmem>>, %arg11: memref<6x2xf32, #tpu.memory_space<vmem>>, %arg12: memref<6x64xf32, #tpu.memory_space<vmem>>) attributes {dimension_semantics = [#tpu.dimension_semantics<arbitrary>], iteration_bounds = array<i64: 1>, scalar_prefetch = 0 : i64, scratch_operands = 1 : i64, tpu.core_type = #tpu.core_type<tc>, window_params = [{pipeline_mode = #tpu.pipeline_mode<synchronous>, transform_indices = @transform_0, window_bounds = array<i64: 20, 32>}, {pipeline_mode = #tpu.pipeline_mode<synchronous>, transform_indices = @transform_1, window_bounds = array<i64: 2, 32>}, {pipeline_mode = #tpu.pipeline_mode<synchronous>, transform_indices = @transform_2, window_bounds = array<i64: 32, 128>}, {pipeline_mode = #tpu.pipeline_mode<synchronous>, transform_indices = @transform_3, window_bounds = array<i64: 4, 64>}, {pipeline_mode = #tpu.pipeline_mode<synchronous>, transform_indices = @transform_4, window_bounds = array<i64: 3, 64>}, {pipeline_mode = #tpu.pipeline_mode<synchronous>, transform_indices = @transform_5, window_bounds = array<i64: 64, 96>}, {pipeline_mode = #tpu.pipeline_mode<synchronous>, transform_indices = @transform_6, window_bounds = array<i64: 16, 64>}, {pipeline_mode = #tpu.pipeline_mode<synchronous>, transform_indices = @transform_7, window_bounds = array<i64: 64, 32>}, {pipeline_mode = #tpu.pipeline_mode<synchronous>, transform_indices = @transform_8, window_bounds = array<i64: 32, 2>}, {pipeline_mode = #tpu.pipeline_mode<synchronous>, transform_indices = @transform_9, window_bounds = array<i64: 1, 2>}, {pipeline_mode = #tpu.pipeline_mode<synchronous>, transform_indices = @transform_10, window_bounds = array<i64: 6, 2>}]} {
    %c0 = arith.constant 0 : index
    %c0_0 = arith.constant 0 : index
    %0 = vector.load %arg1[%c0, %c0_0] : memref<20x32xf32, #tpu.memory_space<vmem>>, vector<20x32xf32>
    %c0_1 = arith.constant 0 : index
    %c0_2 = arith.constant 0 : index
    %1 = vector.load %arg2[%c0_1, %c0_2] : memref<2x32xf32, #tpu.memory_space<vmem>>, vector<1x32xf32>
    %c1 = arith.constant 1 : index
    %c0_3 = arith.constant 0 : index
    %2 = vector.load %arg2[%c1, %c0_3] : memref<2x32xf32, #tpu.memory_space<vmem>>, vector<1x32xf32>
    %c0_4 = arith.constant 0 : index
    %c0_5 = arith.constant 0 : index
    %3 = vector.load %arg5[%c0_4, %c0_5] : memref<3x64xf32, #tpu.memory_space<vmem>>, vector<1x64xf32>
    %c1_6 = arith.constant 1 : index
    %c0_7 = arith.constant 0 : index
    %4 = vector.load %arg5[%c1_6, %c0_7] : memref<3x64xf32, #tpu.memory_space<vmem>>, vector<1x64xf32>
    %c2 = arith.constant 2 : index
    %c0_8 = arith.constant 0 : index
    %5 = vector.load %arg5[%c2, %c0_8] : memref<3x64xf32, #tpu.memory_space<vmem>>, vector<1x64xf32>
    %6 = arith.mulf %0, %0 : vector<20x32xf32>
    %cst = arith.constant dense<0.000000e+00> : vector<20xf32>
    %7 = vector.multi_reduction <add>, %6, %cst [1] : vector<20x32xf32> to vector<20xf32>
    %8 = vector.shape_cast %7 : vector<20xf32> to vector<20x1xf32>
    %cst_9 = arith.constant 3.200000e+01 : f32
    %9 = vector.broadcast %cst_9 : f32 to vector<20x1xf32>
    %10 = arith.divf %8, %9 : vector<20x1xf32>
    %cst_10 = arith.constant 9.99999974E-6 : f32
    %11 = vector.broadcast %cst_10 : f32 to vector<20x1xf32>
    %12 = arith.addf %10, %11 : vector<20x1xf32>
    %13 = math.rsqrt %12 : vector<20x1xf32>
    %14 = vector.broadcast %13 : vector<20x1xf32> to vector<20x32xf32>
    %15 = arith.mulf %0, %14 : vector<20x32xf32>
    %16 = vector.broadcast %1 : vector<1x32xf32> to vector<20x32xf32>
    %17 = arith.mulf %15, %16 : vector<20x32xf32>
    %c0_11 = arith.constant 0 : index
    %c0_12 = arith.constant 0 : index
    %18 = vector.load %arg3[%c0_11, %c0_12] : memref<32x128xf32, #tpu.memory_space<vmem>>, vector<32x128xf32>
    %cst_13 = arith.constant dense<0.000000e+00> : vector<20x128xf32>
    %19 = tpu.matmul %17, %18, %cst_13 {dimension_numbers = #tpu.dot_dimension_numbers<[1], [0], [0], [1], [0, 0, 1, 1], [], []>} : vector<20x32xf32>, vector<32x128xf32>, vector<20x128xf32> -> vector<20x128xf32>
    %20 = vector.extract_strided_slice %19 {offsets = [0, 0], sizes = [20, 64], strides = [1, 1]} : vector<20x128xf32> to vector<20x64xf32>
    %21 = vector.extract_strided_slice %19 {offsets = [0, 64], sizes = [20, 64], strides = [1, 1]} : vector<20x128xf32> to vector<20x64xf32>
    %22 = tpu.iota {dimensions = array<i32: 0>} : vector<20x64xi32>
    %23 = vector.shape_cast %3 : vector<1x64xf32> to vector<1x64xf32>
    %24 = vector.broadcast %23 : vector<1x64xf32> to vector<20x64xf32>
    %cst_14 = arith.constant 0.000000e+00 : f32
    %25 = vector.broadcast %cst_14 : f32 to vector<3x64xf32>
    %26 = vector.extract_strided_slice %20 {offsets = [0, 0], sizes = [17, 64], strides = [1, 1]} : vector<20x64xf32> to vector<17x64xf32>
    %27 = tpu.concatenate %25, %26 in 0 : vector<3x64xf32>, vector<17x64xf32> -> vector<20x64xf32>
    %c10_i32 = arith.constant 10 : i32
    %28 = vector.broadcast %c10_i32 : i32 to vector<20x64xi32>
    %29 = arith.cmpi sge, %22, %28 : vector<20x64xi32>
    %c13_i32 = arith.constant 13 : i32
    %30 = vector.broadcast %c13_i32 : i32 to vector<20x64xi32>
    %31 = arith.cmpi slt, %22, %30 : vector<20x64xi32>
    %32 = arith.andi %29, %31 : vector<20x64xi1>
    %cst_15 = arith.constant 0.000000e+00 : f32
    %33 = vector.broadcast %cst_15 : f32 to vector<20x64xf32>
    %34 = arith.select %32, %33, %27 : vector<20x64xi1>, vector<20x64xf32>
    %c0_16 = arith.constant 0 : index
    %c0_17 = arith.constant 0 : index
    %35 = vector.load %arg4[%c0_16, %c0_17] : memref<4x64xf32, #tpu.memory_space<vmem>>, vector<1x64xf32>
    %36 = vector.broadcast %35 : vector<1x64xf32> to vector<20x64xf32>
    %37 = arith.mulf %34, %36 : vector<20x64xf32>
    %38 = arith.addf %24, %37 : vector<20x64xf32>
    %cst_18 = arith.constant 0.000000e+00 : f32
    %39 = vector.broadcast %cst_18 : f32 to vector<2x64xf32>
    %40 = vector.extract_strided_slice %20 {offsets = [0, 0], sizes = [18, 64], strides = [1, 1]} : vector<20x64xf32> to vector<18x64xf32>
    %41 = tpu.concatenate %39, %40 in 0 : vector<2x64xf32>, vector<18x64xf32> -> vector<20x64xf32>
    %c10_i32_19 = arith.constant 10 : i32
    %42 = vector.broadcast %c10_i32_19 : i32 to vector<20x64xi32>
    %43 = arith.cmpi sge, %22, %42 : vector<20x64xi32>
    %c12_i32 = arith.constant 12 : i32
    %44 = vector.broadcast %c12_i32 : i32 to vector<20x64xi32>
    %45 = arith.cmpi slt, %22, %44 : vector<20x64xi32>
    %46 = arith.andi %43, %45 : vector<20x64xi1>
    %cst_20 = arith.constant 0.000000e+00 : f32
    %47 = vector.broadcast %cst_20 : f32 to vector<20x64xf32>
    %48 = arith.select %46, %47, %41 : vector<20x64xi1>, vector<20x64xf32>
    %c1_21 = arith.constant 1 : index
    %c0_22 = arith.constant 0 : index
    %49 = vector.load %arg4[%c1_21, %c0_22] : memref<4x64xf32, #tpu.memory_space<vmem>>, vector<1x64xf32>
    %50 = vector.broadcast %49 : vector<1x64xf32> to vector<20x64xf32>
    %51 = arith.mulf %48, %50 : vector<20x64xf32>
    %52 = arith.addf %38, %51 : vector<20x64xf32>
    %cst_23 = arith.constant 0.000000e+00 : f32
    %53 = vector.broadcast %cst_23 : f32 to vector<1x64xf32>
    %54 = vector.extract_strided_slice %20 {offsets = [0, 0], sizes = [19, 64], strides = [1, 1]} : vector<20x64xf32> to vector<19x64xf32>
    %55 = tpu.concatenate %53, %54 in 0 : vector<1x64xf32>, vector<19x64xf32> -> vector<20x64xf32>
    %c10_i32_24 = arith.constant 10 : i32
    %56 = vector.broadcast %c10_i32_24 : i32 to vector<20x64xi32>
    %57 = arith.cmpi sge, %22, %56 : vector<20x64xi32>
    %c11_i32 = arith.constant 11 : i32
    %58 = vector.broadcast %c11_i32 : i32 to vector<20x64xi32>
    %59 = arith.cmpi slt, %22, %58 : vector<20x64xi32>
    %60 = arith.andi %57, %59 : vector<20x64xi1>
    %cst_25 = arith.constant 0.000000e+00 : f32
    %61 = vector.broadcast %cst_25 : f32 to vector<20x64xf32>
    %62 = arith.select %60, %61, %55 : vector<20x64xi1>, vector<20x64xf32>
    %c2_26 = arith.constant 2 : index
    %c0_27 = arith.constant 0 : index
    %63 = vector.load %arg4[%c2_26, %c0_27] : memref<4x64xf32, #tpu.memory_space<vmem>>, vector<1x64xf32>
    %64 = vector.broadcast %63 : vector<1x64xf32> to vector<20x64xf32>
    %65 = arith.mulf %62, %64 : vector<20x64xf32>
    %66 = arith.addf %52, %65 : vector<20x64xf32>
    %c3 = arith.constant 3 : index
    %c0_28 = arith.constant 0 : index
    %67 = vector.load %arg4[%c3, %c0_28] : memref<4x64xf32, #tpu.memory_space<vmem>>, vector<1x64xf32>
    %68 = vector.broadcast %67 : vector<1x64xf32> to vector<20x64xf32>
    %69 = arith.mulf %20, %68 : vector<20x64xf32>
    %70 = arith.addf %66, %69 : vector<20x64xf32>
    %cst_29 = arith.constant 0.000000e+00 : f32
    %71 = vector.broadcast %cst_29 : f32 to vector<20x64xf32>
    %72 = arith.subf %71, %70 : vector<20x64xf32>
    %73 = math.exp %72 : vector<20x64xf32>
    %cst_30 = arith.constant 1.000000e+00 : f32
    %74 = vector.broadcast %cst_30 : f32 to vector<20x64xf32>
    %75 = arith.addf %74, %73 : vector<20x64xf32>
    %cst_31 = arith.constant 1.000000e+00 : f32
    %76 = vector.broadcast %cst_31 : f32 to vector<20x64xf32>
    %77 = arith.divf %76, %75 : vector<20x64xf32>
    %78 = arith.mulf %70, %77 : vector<20x64xf32>
    %c0_32 = arith.constant 0 : index
    %c0_33 = arith.constant 0 : index
    %79 = vector.load %arg6[%c0_32, %c0_33] : memref<64x96xf32, #tpu.memory_space<vmem>>, vector<64x96xf32>
    %cst_34 = arith.constant dense<0.000000e+00> : vector<20x96xf32>
    %80 = tpu.matmul %78, %79, %cst_34 {dimension_numbers = #tpu.dot_dimension_numbers<[1], [0], [0], [1], [0, 0, 1, 1], [], []>} : vector<20x64xf32>, vector<64x96xf32>, vector<20x96xf32> -> vector<20x96xf32>
    %81 = vector.extract_strided_slice %80 {offsets = [0, 0], sizes = [20, 16], strides = [1, 1]} : vector<20x96xf32> to vector<20x16xf32>
    %82 = vector.extract_strided_slice %80 {offsets = [0, 16], sizes = [20, 16], strides = [1, 1]} : vector<20x96xf32> to vector<20x16xf32>
    %83 = vector.extract_strided_slice %80 {offsets = [0, 32], sizes = [20, 64], strides = [1, 1]} : vector<20x96xf32> to vector<20x64xf32>
    %84 = vector.broadcast %4 : vector<1x64xf32> to vector<20x64xf32>
    %85 = arith.addf %83, %84 : vector<20x64xf32>
    %cst_35 = arith.constant 0.000000e+00 : f32
    %86 = vector.broadcast %cst_35 : f32 to vector<20x64xf32>
    %87 = arith.maximumf %85, %86 : vector<20x64xf32>
    %88 = math.absf %85 : vector<20x64xf32>
    %cst_36 = arith.constant 0.000000e+00 : f32
    %89 = vector.broadcast %cst_36 : f32 to vector<20x64xf32>
    %90 = arith.subf %89, %88 : vector<20x64xf32>
    %91 = math.exp %90 : vector<20x64xf32>
    %cst_37 = arith.constant 1.000000e+00 : f32
    %92 = vector.broadcast %cst_37 : f32 to vector<20x64xf32>
    %93 = arith.addf %92, %91 : vector<20x64xf32>
    %94 = math.log %93 : vector<20x64xf32>
    %95 = arith.addf %87, %94 : vector<20x64xf32>
    %c0_38 = arith.constant 0 : index
    %c0_39 = arith.constant 0 : index
    %96 = vector.load %arg7[%c0_38, %c0_39] : memref<16x64xf32, #tpu.memory_space<vmem>>, vector<16x64xf32>
    %97 = arith.mulf %95, %78 : vector<20x64xf32>
    %98 = tpu.transpose %81, [1, 0] : vector<20x16xf32> -> vector<16x20xf32>
    %99 = vector.extract_strided_slice %95 {offsets = [0, 0], sizes = [1, 64], strides = [1, 1]} : vector<20x64xf32> to vector<1x64xf32>
    %100 = vector.broadcast %99 : vector<1x64xf32> to vector<16x64xf32>
    %101 = arith.mulf %96, %100 : vector<16x64xf32>
    %102 = math.exp %101 : vector<16x64xf32>
    %103 = vector.extract_strided_slice %95 {offsets = [1, 0], sizes = [1, 64], strides = [1, 1]} : vector<20x64xf32> to vector<1x64xf32>
    %104 = vector.broadcast %103 : vector<1x64xf32> to vector<16x64xf32>
    %105 = arith.mulf %96, %104 : vector<16x64xf32>
    %106 = math.exp %105 : vector<16x64xf32>
    %107 = vector.extract_strided_slice %95 {offsets = [2, 0], sizes = [1, 64], strides = [1, 1]} : vector<20x64xf32> to vector<1x64xf32>
    %108 = vector.broadcast %107 : vector<1x64xf32> to vector<16x64xf32>
    %109 = arith.mulf %96, %108 : vector<16x64xf32>
    %110 = math.exp %109 : vector<16x64xf32>
    %111 = vector.extract_strided_slice %95 {offsets = [3, 0], sizes = [1, 64], strides = [1, 1]} : vector<20x64xf32> to vector<1x64xf32>
    %112 = vector.broadcast %111 : vector<1x64xf32> to vector<16x64xf32>
    %113 = arith.mulf %96, %112 : vector<16x64xf32>
    %114 = math.exp %113 : vector<16x64xf32>
    %115 = vector.extract_strided_slice %95 {offsets = [4, 0], sizes = [1, 64], strides = [1, 1]} : vector<20x64xf32> to vector<1x64xf32>
    %116 = vector.broadcast %115 : vector<1x64xf32> to vector<16x64xf32>
    %117 = arith.mulf %96, %116 : vector<16x64xf32>
    %118 = math.exp %117 : vector<16x64xf32>
    %119 = vector.extract_strided_slice %95 {offsets = [5, 0], sizes = [1, 64], strides = [1, 1]} : vector<20x64xf32> to vector<1x64xf32>
    %120 = vector.broadcast %119 : vector<1x64xf32> to vector<16x64xf32>
    %121 = arith.mulf %96, %120 : vector<16x64xf32>
    %122 = math.exp %121 : vector<16x64xf32>
    %123 = vector.extract_strided_slice %95 {offsets = [6, 0], sizes = [1, 64], strides = [1, 1]} : vector<20x64xf32> to vector<1x64xf32>
    %124 = vector.broadcast %123 : vector<1x64xf32> to vector<16x64xf32>
    %125 = arith.mulf %96, %124 : vector<16x64xf32>
    %126 = math.exp %125 : vector<16x64xf32>
    %127 = vector.extract_strided_slice %95 {offsets = [7, 0], sizes = [1, 64], strides = [1, 1]} : vector<20x64xf32> to vector<1x64xf32>
    %128 = vector.broadcast %127 : vector<1x64xf32> to vector<16x64xf32>
    %129 = arith.mulf %96, %128 : vector<16x64xf32>
    %130 = math.exp %129 : vector<16x64xf32>
    %131 = vector.extract_strided_slice %95 {offsets = [8, 0], sizes = [1, 64], strides = [1, 1]} : vector<20x64xf32> to vector<1x64xf32>
    %132 = vector.broadcast %131 : vector<1x64xf32> to vector<16x64xf32>
    %133 = arith.mulf %96, %132 : vector<16x64xf32>
    %134 = math.exp %133 : vector<16x64xf32>
    %135 = vector.extract_strided_slice %95 {offsets = [9, 0], sizes = [1, 64], strides = [1, 1]} : vector<20x64xf32> to vector<1x64xf32>
    %136 = vector.broadcast %135 : vector<1x64xf32> to vector<16x64xf32>
    %137 = arith.mulf %96, %136 : vector<16x64xf32>
    %138 = math.exp %137 : vector<16x64xf32>
    %139 = vector.extract_strided_slice %95 {offsets = [10, 0], sizes = [1, 64], strides = [1, 1]} : vector<20x64xf32> to vector<1x64xf32>
    %140 = vector.broadcast %139 : vector<1x64xf32> to vector<16x64xf32>
    %141 = arith.mulf %96, %140 : vector<16x64xf32>
    %142 = math.exp %141 : vector<16x64xf32>
    %143 = vector.extract_strided_slice %95 {offsets = [11, 0], sizes = [1, 64], strides = [1, 1]} : vector<20x64xf32> to vector<1x64xf32>
    %144 = vector.broadcast %143 : vector<1x64xf32> to vector<16x64xf32>
    %145 = arith.mulf %96, %144 : vector<16x64xf32>
    %146 = math.exp %145 : vector<16x64xf32>
    %147 = vector.extract_strided_slice %95 {offsets = [12, 0], sizes = [1, 64], strides = [1, 1]} : vector<20x64xf32> to vector<1x64xf32>
    %148 = vector.broadcast %147 : vector<1x64xf32> to vector<16x64xf32>
    %149 = arith.mulf %96, %148 : vector<16x64xf32>
    %150 = math.exp %149 : vector<16x64xf32>
    %151 = vector.extract_strided_slice %95 {offsets = [13, 0], sizes = [1, 64], strides = [1, 1]} : vector<20x64xf32> to vector<1x64xf32>
    %152 = vector.broadcast %151 : vector<1x64xf32> to vector<16x64xf32>
    %153 = arith.mulf %96, %152 : vector<16x64xf32>
    %154 = math.exp %153 : vector<16x64xf32>
    %155 = vector.extract_strided_slice %95 {offsets = [14, 0], sizes = [1, 64], strides = [1, 1]} : vector<20x64xf32> to vector<1x64xf32>
    %156 = vector.broadcast %155 : vector<1x64xf32> to vector<16x64xf32>
    %157 = arith.mulf %96, %156 : vector<16x64xf32>
    %158 = math.exp %157 : vector<16x64xf32>
    %159 = vector.extract_strided_slice %95 {offsets = [15, 0], sizes = [1, 64], strides = [1, 1]} : vector<20x64xf32> to vector<1x64xf32>
    %160 = vector.broadcast %159 : vector<1x64xf32> to vector<16x64xf32>
    %161 = arith.mulf %96, %160 : vector<16x64xf32>
    %162 = math.exp %161 : vector<16x64xf32>
    %163 = vector.extract_strided_slice %95 {offsets = [16, 0], sizes = [1, 64], strides = [1, 1]} : vector<20x64xf32> to vector<1x64xf32>
    %164 = vector.broadcast %163 : vector<1x64xf32> to vector<16x64xf32>
    %165 = arith.mulf %96, %164 : vector<16x64xf32>
    %166 = math.exp %165 : vector<16x64xf32>
    %167 = vector.extract_strided_slice %95 {offsets = [17, 0], sizes = [1, 64], strides = [1, 1]} : vector<20x64xf32> to vector<1x64xf32>
    %168 = vector.broadcast %167 : vector<1x64xf32> to vector<16x64xf32>
    %169 = arith.mulf %96, %168 : vector<16x64xf32>
    %170 = math.exp %169 : vector<16x64xf32>
    %171 = vector.extract_strided_slice %95 {offsets = [18, 0], sizes = [1, 64], strides = [1, 1]} : vector<20x64xf32> to vector<1x64xf32>
    %172 = vector.broadcast %171 : vector<1x64xf32> to vector<16x64xf32>
    %173 = arith.mulf %96, %172 : vector<16x64xf32>
    %174 = math.exp %173 : vector<16x64xf32>
    %175 = vector.extract_strided_slice %95 {offsets = [19, 0], sizes = [1, 64], strides = [1, 1]} : vector<20x64xf32> to vector<1x64xf32>
    %176 = vector.broadcast %175 : vector<1x64xf32> to vector<16x64xf32>
    %177 = arith.mulf %96, %176 : vector<16x64xf32>
    %178 = math.exp %177 : vector<16x64xf32>
    %179 = vector.extract_strided_slice %98 {offsets = [0, 0], sizes = [16, 1], strides = [1, 1]} : vector<16x20xf32> to vector<16x1xf32>
    %180 = vector.extract_strided_slice %97 {offsets = [0, 0], sizes = [1, 64], strides = [1, 1]} : vector<20x64xf32> to vector<1x64xf32>
    %181 = vector.broadcast %179 : vector<16x1xf32> to vector<16x64xf32>
    %182 = vector.broadcast %180 : vector<1x64xf32> to vector<16x64xf32>
    %183 = arith.mulf %181, %182 : vector<16x64xf32>
    %184 = vector.extract_strided_slice %98 {offsets = [0, 1], sizes = [16, 1], strides = [1, 1]} : vector<16x20xf32> to vector<16x1xf32>
    %185 = vector.extract_strided_slice %97 {offsets = [1, 0], sizes = [1, 64], strides = [1, 1]} : vector<20x64xf32> to vector<1x64xf32>
    %186 = vector.broadcast %184 : vector<16x1xf32> to vector<16x64xf32>
    %187 = vector.broadcast %185 : vector<1x64xf32> to vector<16x64xf32>
    %188 = arith.mulf %186, %187 : vector<16x64xf32>
    %189 = vector.extract_strided_slice %98 {offsets = [0, 2], sizes = [16, 1], strides = [1, 1]} : vector<16x20xf32> to vector<16x1xf32>
    %190 = vector.extract_strided_slice %97 {offsets = [2, 0], sizes = [1, 64], strides = [1, 1]} : vector<20x64xf32> to vector<1x64xf32>
    %191 = vector.broadcast %189 : vector<16x1xf32> to vector<16x64xf32>
    %192 = vector.broadcast %190 : vector<1x64xf32> to vector<16x64xf32>
    %193 = arith.mulf %191, %192 : vector<16x64xf32>
    %194 = vector.extract_strided_slice %98 {offsets = [0, 3], sizes = [16, 1], strides = [1, 1]} : vector<16x20xf32> to vector<16x1xf32>
    %195 = vector.extract_strided_slice %97 {offsets = [3, 0], sizes = [1, 64], strides = [1, 1]} : vector<20x64xf32> to vector<1x64xf32>
    %196 = vector.broadcast %194 : vector<16x1xf32> to vector<16x64xf32>
    %197 = vector.broadcast %195 : vector<1x64xf32> to vector<16x64xf32>
    %198 = arith.mulf %196, %197 : vector<16x64xf32>
    %199 = vector.extract_strided_slice %98 {offsets = [0, 4], sizes = [16, 1], strides = [1, 1]} : vector<16x20xf32> to vector<16x1xf32>
    %200 = vector.extract_strided_slice %97 {offsets = [4, 0], sizes = [1, 64], strides = [1, 1]} : vector<20x64xf32> to vector<1x64xf32>
    %201 = vector.broadcast %199 : vector<16x1xf32> to vector<16x64xf32>
    %202 = vector.broadcast %200 : vector<1x64xf32> to vector<16x64xf32>
    %203 = arith.mulf %201, %202 : vector<16x64xf32>
    %204 = vector.extract_strided_slice %98 {offsets = [0, 5], sizes = [16, 1], strides = [1, 1]} : vector<16x20xf32> to vector<16x1xf32>
    %205 = vector.extract_strided_slice %97 {offsets = [5, 0], sizes = [1, 64], strides = [1, 1]} : vector<20x64xf32> to vector<1x64xf32>
    %206 = vector.broadcast %204 : vector<16x1xf32> to vector<16x64xf32>
    %207 = vector.broadcast %205 : vector<1x64xf32> to vector<16x64xf32>
    %208 = arith.mulf %206, %207 : vector<16x64xf32>
    %209 = vector.extract_strided_slice %98 {offsets = [0, 6], sizes = [16, 1], strides = [1, 1]} : vector<16x20xf32> to vector<16x1xf32>
    %210 = vector.extract_strided_slice %97 {offsets = [6, 0], sizes = [1, 64], strides = [1, 1]} : vector<20x64xf32> to vector<1x64xf32>
    %211 = vector.broadcast %209 : vector<16x1xf32> to vector<16x64xf32>
    %212 = vector.broadcast %210 : vector<1x64xf32> to vector<16x64xf32>
    %213 = arith.mulf %211, %212 : vector<16x64xf32>
    %214 = vector.extract_strided_slice %98 {offsets = [0, 7], sizes = [16, 1], strides = [1, 1]} : vector<16x20xf32> to vector<16x1xf32>
    %215 = vector.extract_strided_slice %97 {offsets = [7, 0], sizes = [1, 64], strides = [1, 1]} : vector<20x64xf32> to vector<1x64xf32>
    %216 = vector.broadcast %214 : vector<16x1xf32> to vector<16x64xf32>
    %217 = vector.broadcast %215 : vector<1x64xf32> to vector<16x64xf32>
    %218 = arith.mulf %216, %217 : vector<16x64xf32>
    %219 = vector.extract_strided_slice %98 {offsets = [0, 8], sizes = [16, 1], strides = [1, 1]} : vector<16x20xf32> to vector<16x1xf32>
    %220 = vector.extract_strided_slice %97 {offsets = [8, 0], sizes = [1, 64], strides = [1, 1]} : vector<20x64xf32> to vector<1x64xf32>
    %221 = vector.broadcast %219 : vector<16x1xf32> to vector<16x64xf32>
    %222 = vector.broadcast %220 : vector<1x64xf32> to vector<16x64xf32>
    %223 = arith.mulf %221, %222 : vector<16x64xf32>
    %224 = vector.extract_strided_slice %98 {offsets = [0, 9], sizes = [16, 1], strides = [1, 1]} : vector<16x20xf32> to vector<16x1xf32>
    %225 = vector.extract_strided_slice %97 {offsets = [9, 0], sizes = [1, 64], strides = [1, 1]} : vector<20x64xf32> to vector<1x64xf32>
    %226 = vector.broadcast %224 : vector<16x1xf32> to vector<16x64xf32>
    %227 = vector.broadcast %225 : vector<1x64xf32> to vector<16x64xf32>
    %228 = arith.mulf %226, %227 : vector<16x64xf32>
    %229 = vector.extract_strided_slice %98 {offsets = [0, 10], sizes = [16, 1], strides = [1, 1]} : vector<16x20xf32> to vector<16x1xf32>
    %230 = vector.extract_strided_slice %97 {offsets = [10, 0], sizes = [1, 64], strides = [1, 1]} : vector<20x64xf32> to vector<1x64xf32>
    %231 = vector.broadcast %229 : vector<16x1xf32> to vector<16x64xf32>
    %232 = vector.broadcast %230 : vector<1x64xf32> to vector<16x64xf32>
    %233 = arith.mulf %231, %232 : vector<16x64xf32>
    %234 = vector.extract_strided_slice %98 {offsets = [0, 11], sizes = [16, 1], strides = [1, 1]} : vector<16x20xf32> to vector<16x1xf32>
    %235 = vector.extract_strided_slice %97 {offsets = [11, 0], sizes = [1, 64], strides = [1, 1]} : vector<20x64xf32> to vector<1x64xf32>
    %236 = vector.broadcast %234 : vector<16x1xf32> to vector<16x64xf32>
    %237 = vector.broadcast %235 : vector<1x64xf32> to vector<16x64xf32>
    %238 = arith.mulf %236, %237 : vector<16x64xf32>
    %239 = vector.extract_strided_slice %98 {offsets = [0, 12], sizes = [16, 1], strides = [1, 1]} : vector<16x20xf32> to vector<16x1xf32>
    %240 = vector.extract_strided_slice %97 {offsets = [12, 0], sizes = [1, 64], strides = [1, 1]} : vector<20x64xf32> to vector<1x64xf32>
    %241 = vector.broadcast %239 : vector<16x1xf32> to vector<16x64xf32>
    %242 = vector.broadcast %240 : vector<1x64xf32> to vector<16x64xf32>
    %243 = arith.mulf %241, %242 : vector<16x64xf32>
    %244 = vector.extract_strided_slice %98 {offsets = [0, 13], sizes = [16, 1], strides = [1, 1]} : vector<16x20xf32> to vector<16x1xf32>
    %245 = vector.extract_strided_slice %97 {offsets = [13, 0], sizes = [1, 64], strides = [1, 1]} : vector<20x64xf32> to vector<1x64xf32>
    %246 = vector.broadcast %244 : vector<16x1xf32> to vector<16x64xf32>
    %247 = vector.broadcast %245 : vector<1x64xf32> to vector<16x64xf32>
    %248 = arith.mulf %246, %247 : vector<16x64xf32>
    %249 = vector.extract_strided_slice %98 {offsets = [0, 14], sizes = [16, 1], strides = [1, 1]} : vector<16x20xf32> to vector<16x1xf32>
    %250 = vector.extract_strided_slice %97 {offsets = [14, 0], sizes = [1, 64], strides = [1, 1]} : vector<20x64xf32> to vector<1x64xf32>
    %251 = vector.broadcast %249 : vector<16x1xf32> to vector<16x64xf32>
    %252 = vector.broadcast %250 : vector<1x64xf32> to vector<16x64xf32>
    %253 = arith.mulf %251, %252 : vector<16x64xf32>
    %254 = vector.extract_strided_slice %98 {offsets = [0, 15], sizes = [16, 1], strides = [1, 1]} : vector<16x20xf32> to vector<16x1xf32>
    %255 = vector.extract_strided_slice %97 {offsets = [15, 0], sizes = [1, 64], strides = [1, 1]} : vector<20x64xf32> to vector<1x64xf32>
    %256 = vector.broadcast %254 : vector<16x1xf32> to vector<16x64xf32>
    %257 = vector.broadcast %255 : vector<1x64xf32> to vector<16x64xf32>
    %258 = arith.mulf %256, %257 : vector<16x64xf32>
    %259 = vector.extract_strided_slice %98 {offsets = [0, 16], sizes = [16, 1], strides = [1, 1]} : vector<16x20xf32> to vector<16x1xf32>
    %260 = vector.extract_strided_slice %97 {offsets = [16, 0], sizes = [1, 64], strides = [1, 1]} : vector<20x64xf32> to vector<1x64xf32>
    %261 = vector.broadcast %259 : vector<16x1xf32> to vector<16x64xf32>
    %262 = vector.broadcast %260 : vector<1x64xf32> to vector<16x64xf32>
    %263 = arith.mulf %261, %262 : vector<16x64xf32>
    %264 = vector.extract_strided_slice %98 {offsets = [0, 17], sizes = [16, 1], strides = [1, 1]} : vector<16x20xf32> to vector<16x1xf32>
    %265 = vector.extract_strided_slice %97 {offsets = [17, 0], sizes = [1, 64], strides = [1, 1]} : vector<20x64xf32> to vector<1x64xf32>
    %266 = vector.broadcast %264 : vector<16x1xf32> to vector<16x64xf32>
    %267 = vector.broadcast %265 : vector<1x64xf32> to vector<16x64xf32>
    %268 = arith.mulf %266, %267 : vector<16x64xf32>
    %269 = vector.extract_strided_slice %98 {offsets = [0, 18], sizes = [16, 1], strides = [1, 1]} : vector<16x20xf32> to vector<16x1xf32>
    %270 = vector.extract_strided_slice %97 {offsets = [18, 0], sizes = [1, 64], strides = [1, 1]} : vector<20x64xf32> to vector<1x64xf32>
    %271 = vector.broadcast %269 : vector<16x1xf32> to vector<16x64xf32>
    %272 = vector.broadcast %270 : vector<1x64xf32> to vector<16x64xf32>
    %273 = arith.mulf %271, %272 : vector<16x64xf32>
    %274 = vector.extract_strided_slice %98 {offsets = [0, 19], sizes = [16, 1], strides = [1, 1]} : vector<16x20xf32> to vector<16x1xf32>
    %275 = vector.extract_strided_slice %97 {offsets = [19, 0], sizes = [1, 64], strides = [1, 1]} : vector<20x64xf32> to vector<1x64xf32>
    %276 = vector.broadcast %274 : vector<16x1xf32> to vector<16x64xf32>
    %277 = vector.broadcast %275 : vector<1x64xf32> to vector<16x64xf32>
    %278 = arith.mulf %276, %277 : vector<16x64xf32>
    %cst_40 = arith.constant 0.000000e+00 : f32
    %279 = vector.broadcast %cst_40 : f32 to vector<16x64xf32>
    %cst_41 = arith.constant 0.000000e+00 : f32
    %280 = vector.broadcast %cst_41 : f32 to vector<16x64xf32>
    %281 = arith.mulf %102, %279 : vector<16x64xf32>
    %282 = arith.addf %281, %183 : vector<16x64xf32>
    %283 = arith.mulf %142, %280 : vector<16x64xf32>
    %284 = arith.addf %283, %233 : vector<16x64xf32>
    %285 = arith.mulf %106, %282 : vector<16x64xf32>
    %286 = arith.addf %285, %188 : vector<16x64xf32>
    %287 = arith.mulf %146, %284 : vector<16x64xf32>
    %288 = arith.addf %287, %238 : vector<16x64xf32>
    %289 = arith.mulf %110, %286 : vector<16x64xf32>
    %290 = arith.addf %289, %193 : vector<16x64xf32>
    %291 = arith.mulf %150, %288 : vector<16x64xf32>
    %292 = arith.addf %291, %243 : vector<16x64xf32>
    %293 = arith.mulf %114, %290 : vector<16x64xf32>
    %294 = arith.addf %293, %198 : vector<16x64xf32>
    %295 = arith.mulf %154, %292 : vector<16x64xf32>
    %296 = arith.addf %295, %248 : vector<16x64xf32>
    %297 = arith.mulf %118, %294 : vector<16x64xf32>
    %298 = arith.addf %297, %203 : vector<16x64xf32>
    %299 = arith.mulf %158, %296 : vector<16x64xf32>
    %300 = arith.addf %299, %253 : vector<16x64xf32>
    %301 = arith.mulf %122, %298 : vector<16x64xf32>
    %302 = arith.addf %301, %208 : vector<16x64xf32>
    %303 = arith.mulf %162, %300 : vector<16x64xf32>
    %304 = arith.addf %303, %258 : vector<16x64xf32>
    %305 = arith.mulf %126, %302 : vector<16x64xf32>
    %306 = arith.addf %305, %213 : vector<16x64xf32>
    %307 = arith.mulf %166, %304 : vector<16x64xf32>
    %308 = arith.addf %307, %263 : vector<16x64xf32>
    %309 = arith.mulf %130, %306 : vector<16x64xf32>
    %310 = arith.addf %309, %218 : vector<16x64xf32>
    %311 = vector.extract_strided_slice %82 {offsets = [7, 0], sizes = [1, 16], strides = [1, 1]} : vector<20x16xf32> to vector<1x16xf32>
    %cst_42 = arith.constant dense<0.000000e+00> : vector<1x64xf32>
    %312 = tpu.matmul %311, %310, %cst_42 {dimension_numbers = #tpu.dot_dimension_numbers<[1], [0], [0], [1], [0, 0, 1, 1], [], []>} : vector<1x16xf32>, vector<16x64xf32>, vector<1x64xf32> -> vector<1x64xf32>
    %313 = vector.extract_strided_slice %78 {offsets = [7, 0], sizes = [1, 64], strides = [1, 1]} : vector<20x64xf32> to vector<1x64xf32>
    %314 = arith.mulf %5, %313 : vector<1x64xf32>
    %315 = arith.addf %312, %314 : vector<1x64xf32>
    %c0_43 = arith.constant 0 : index
    %c0_44 = arith.constant 0 : index
    %316 = vector.load %arg12[%c0_43, %c0_44] : memref<6x64xf32, #tpu.memory_space<vmem>>, vector<1x64xf32>
    tpu.vector_store %arg12[%c0_43, %c0_44], %315 {strides = array<i32>} : memref<6x64xf32, #tpu.memory_space<vmem>>, vector<1x64xf32>,
    %317 = arith.mulf %170, %308 : vector<16x64xf32>
    %318 = arith.addf %317, %268 : vector<16x64xf32>
    %319 = vector.extract_strided_slice %82 {offsets = [17, 0], sizes = [1, 16], strides = [1, 1]} : vector<20x16xf32> to vector<1x16xf32>
    %cst_45 = arith.constant dense<0.000000e+00> : vector<1x64xf32>
    %320 = tpu.matmul %319, %318, %cst_45 {dimension_numbers = #tpu.dot_dimension_numbers<[1], [0], [0], [1], [0, 0, 1, 1], [], []>} : vector<1x16xf32>, vector<16x64xf32>, vector<1x64xf32> -> vector<1x64xf32>
    %321 = vector.extract_strided_slice %78 {offsets = [17, 0], sizes = [1, 64], strides = [1, 1]} : vector<20x64xf32> to vector<1x64xf32>
    %322 = arith.mulf %5, %321 : vector<1x64xf32>
    %323 = arith.addf %320, %322 : vector<1x64xf32>
    %c3_46 = arith.constant 3 : index
    %c0_47 = arith.constant 0 : index
    %324 = vector.load %arg12[%c3_46, %c0_47] : memref<6x64xf32, #tpu.memory_space<vmem>>, vector<1x64xf32>
    tpu.vector_store %arg12[%c3_46, %c0_47], %323 {strides = array<i32>} : memref<6x64xf32, #tpu.memory_space<vmem>>, vector<1x64xf32>,
    %325 = arith.mulf %134, %310 : vector<16x64xf32>
    %326 = arith.addf %325, %223 : vector<16x64xf32>
    %327 = vector.extract_strided_slice %82 {offsets = [8, 0], sizes = [1, 16], strides = [1, 1]} : vector<20x16xf32> to vector<1x16xf32>
    %cst_48 = arith.constant dense<0.000000e+00> : vector<1x64xf32>
    %328 = tpu.matmul %327, %326, %cst_48 {dimension_numbers = #tpu.dot_dimension_numbers<[1], [0], [0], [1], [0, 0, 1, 1], [], []>} : vector<1x16xf32>, vector<16x64xf32>, vector<1x64xf32> -> vector<1x64xf32>
    %329 = vector.extract_strided_slice %78 {offsets = [8, 0], sizes = [1, 64], strides = [1, 1]} : vector<20x64xf32> to vector<1x64xf32>
    %330 = arith.mulf %5, %329 : vector<1x64xf32>
    %331 = arith.addf %328, %330 : vector<1x64xf32>
    %c1_49 = arith.constant 1 : index
    %c0_50 = arith.constant 0 : index
    %332 = vector.load %arg12[%c1_49, %c0_50] : memref<6x64xf32, #tpu.memory_space<vmem>>, vector<1x64xf32>
    tpu.vector_store %arg12[%c1_49, %c0_50], %331 {strides = array<i32>} : memref<6x64xf32, #tpu.memory_space<vmem>>, vector<1x64xf32>,
    %333 = arith.mulf %174, %318 : vector<16x64xf32>
    %334 = arith.addf %333, %273 : vector<16x64xf32>
    %335 = vector.extract_strided_slice %82 {offsets = [18, 0], sizes = [1, 16], strides = [1, 1]} : vector<20x16xf32> to vector<1x16xf32>
    %cst_51 = arith.constant dense<0.000000e+00> : vector<1x64xf32>
    %336 = tpu.matmul %335, %334, %cst_51 {dimension_numbers = #tpu.dot_dimension_numbers<[1], [0], [0], [1], [0, 0, 1, 1], [], []>} : vector<1x16xf32>, vector<16x64xf32>, vector<1x64xf32> -> vector<1x64xf32>
    %337 = vector.extract_strided_slice %78 {offsets = [18, 0], sizes = [1, 64], strides = [1, 1]} : vector<20x64xf32> to vector<1x64xf32>
    %338 = arith.mulf %5, %337 : vector<1x64xf32>
    %339 = arith.addf %336, %338 : vector<1x64xf32>
    %c4 = arith.constant 4 : index
    %c0_52 = arith.constant 0 : index
    %340 = vector.load %arg12[%c4, %c0_52] : memref<6x64xf32, #tpu.memory_space<vmem>>, vector<1x64xf32>
    tpu.vector_store %arg12[%c4, %c0_52], %339 {strides = array<i32>} : memref<6x64xf32, #tpu.memory_space<vmem>>, vector<1x64xf32>,
    %341 = arith.mulf %138, %326 : vector<16x64xf32>
    %342 = arith.addf %341, %228 : vector<16x64xf32>
    %343 = vector.extract_strided_slice %82 {offsets = [9, 0], sizes = [1, 16], strides = [1, 1]} : vector<20x16xf32> to vector<1x16xf32>
    %cst_53 = arith.constant dense<0.000000e+00> : vector<1x64xf32>
    %344 = tpu.matmul %343, %342, %cst_53 {dimension_numbers = #tpu.dot_dimension_numbers<[1], [0], [0], [1], [0, 0, 1, 1], [], []>} : vector<1x16xf32>, vector<16x64xf32>, vector<1x64xf32> -> vector<1x64xf32>
    %345 = vector.extract_strided_slice %78 {offsets = [9, 0], sizes = [1, 64], strides = [1, 1]} : vector<20x64xf32> to vector<1x64xf32>
    %346 = arith.mulf %5, %345 : vector<1x64xf32>
    %347 = arith.addf %344, %346 : vector<1x64xf32>
    %c2_54 = arith.constant 2 : index
    %c0_55 = arith.constant 0 : index
    %348 = vector.load %arg12[%c2_54, %c0_55] : memref<6x64xf32, #tpu.memory_space<vmem>>, vector<1x64xf32>
    tpu.vector_store %arg12[%c2_54, %c0_55], %347 {strides = array<i32>} : memref<6x64xf32, #tpu.memory_space<vmem>>, vector<1x64xf32>,
    %349 = arith.mulf %178, %334 : vector<16x64xf32>
    %350 = arith.addf %349, %278 : vector<16x64xf32>
    %351 = vector.extract_strided_slice %82 {offsets = [19, 0], sizes = [1, 16], strides = [1, 1]} : vector<20x16xf32> to vector<1x16xf32>
    %cst_56 = arith.constant dense<0.000000e+00> : vector<1x64xf32>
    %352 = tpu.matmul %351, %350, %cst_56 {dimension_numbers = #tpu.dot_dimension_numbers<[1], [0], [0], [1], [0, 0, 1, 1], [], []>} : vector<1x16xf32>, vector<16x64xf32>, vector<1x64xf32> -> vector<1x64xf32>
    %353 = vector.extract_strided_slice %78 {offsets = [19, 0], sizes = [1, 64], strides = [1, 1]} : vector<20x64xf32> to vector<1x64xf32>
    %354 = arith.mulf %5, %353 : vector<1x64xf32>
    %355 = arith.addf %352, %354 : vector<1x64xf32>
    %c5 = arith.constant 5 : index
    %c0_57 = arith.constant 0 : index
    %356 = vector.load %arg12[%c5, %c0_57] : memref<6x64xf32, #tpu.memory_space<vmem>>, vector<1x64xf32>
    tpu.vector_store %arg12[%c5, %c0_57], %355 {strides = array<i32>} : memref<6x64xf32, #tpu.memory_space<vmem>>, vector<1x64xf32>,
    %357 = vector.extract_strided_slice %21 {offsets = [7, 0], sizes = [3, 64], strides = [1, 1]} : vector<20x64xf32> to vector<3x64xf32>
    %358 = vector.extract_strided_slice %21 {offsets = [17, 0], sizes = [3, 64], strides = [1, 1]} : vector<20x64xf32> to vector<3x64xf32>
    %359 = tpu.concatenate %357, %358 in 0 : vector<3x64xf32>, vector<3x64xf32> -> vector<6x64xf32>
    %360 = vector.extract_strided_slice %0 {offsets = [7, 0], sizes = [3, 32], strides = [1, 1]} : vector<20x32xf32> to vector<3x32xf32>
    %361 = vector.extract_strided_slice %0 {offsets = [17, 0], sizes = [3, 32], strides = [1, 1]} : vector<20x32xf32> to vector<3x32xf32>
    %362 = tpu.concatenate %360, %361 in 0 : vector<3x32xf32>, vector<3x32xf32> -> vector<6x32xf32>
    %c0_58 = arith.constant 0 : index
    %c0_59 = arith.constant 0 : index
    %363 = vector.load %arg12[%c0_58, %c0_59] : memref<6x64xf32, #tpu.memory_space<vmem>>, vector<6x64xf32>
    %cst_60 = arith.constant 0.000000e+00 : f32
    %364 = vector.broadcast %cst_60 : f32 to vector<6x64xf32>
    %365 = arith.subf %364, %359 : vector<6x64xf32>
    %366 = math.exp %365 : vector<6x64xf32>
    %cst_61 = arith.constant 1.000000e+00 : f32
    %367 = vector.broadcast %cst_61 : f32 to vector<6x64xf32>
    %368 = arith.addf %367, %366 : vector<6x64xf32>
    %cst_62 = arith.constant 1.000000e+00 : f32
    %369 = vector.broadcast %cst_62 : f32 to vector<6x64xf32>
    %370 = arith.divf %369, %368 : vector<6x64xf32>
    %371 = arith.mulf %359, %370 : vector<6x64xf32>
    %372 = arith.mulf %363, %371 : vector<6x64xf32>
    %c0_63 = arith.constant 0 : index
    %c0_64 = arith.constant 0 : index
    %373 = vector.load %arg8[%c0_63, %c0_64] : memref<64x32xf32, #tpu.memory_space<vmem>>, vector<64x32xf32>
    %cst_65 = arith.constant dense<0.000000e+00> : vector<6x32xf32>
    %374 = tpu.matmul %372, %373, %cst_65 {dimension_numbers = #tpu.dot_dimension_numbers<[1], [0], [0], [1], [0, 0, 1, 1], [], []>} : vector<6x64xf32>, vector<64x32xf32>, vector<6x32xf32> -> vector<6x32xf32>
    %375 = arith.addf %362, %374 : vector<6x32xf32>
    %376 = arith.mulf %375, %375 : vector<6x32xf32>
    %cst_66 = arith.constant dense<0.000000e+00> : vector<6xf32>
    %377 = vector.multi_reduction <add>, %376, %cst_66 [1] : vector<6x32xf32> to vector<6xf32>
    %378 = vector.shape_cast %377 : vector<6xf32> to vector<6x1xf32>
    %cst_67 = arith.constant 3.200000e+01 : f32
    %379 = vector.broadcast %cst_67 : f32 to vector<6x1xf32>
    %380 = arith.divf %378, %379 : vector<6x1xf32>
    %cst_68 = arith.constant 9.99999974E-6 : f32
    %381 = vector.broadcast %cst_68 : f32 to vector<6x1xf32>
    %382 = arith.addf %380, %381 : vector<6x1xf32>
    %383 = math.rsqrt %382 : vector<6x1xf32>
    %384 = vector.broadcast %383 : vector<6x1xf32> to vector<6x32xf32>
    %385 = arith.mulf %375, %384 : vector<6x32xf32>
    %386 = vector.broadcast %2 : vector<1x32xf32> to vector<6x32xf32>
    %387 = arith.mulf %385, %386 : vector<6x32xf32>
    %c0_69 = arith.constant 0 : index
    %c0_70 = arith.constant 0 : index
    %388 = vector.load %arg9[%c0_69, %c0_70] : memref<32x2xf32, #tpu.memory_space<vmem>>, vector<32x2xf32>
    %cst_71 = arith.constant dense<0.000000e+00> : vector<6x2xf32>
    %389 = tpu.matmul %387, %388, %cst_71 {dimension_numbers = #tpu.dot_dimension_numbers<[1], [0], [0], [1], [0, 0, 1, 1], [], []>} : vector<6x32xf32>, vector<32x2xf32>, vector<6x2xf32> -> vector<6x2xf32>
    %c0_72 = arith.constant 0 : index
    %c0_73 = arith.constant 0 : index
    %390 = vector.load %arg10[%c0_72, %c0_73] : memref<1x2xf32, #tpu.memory_space<vmem>>, vector<1x2xf32>
    %391 = vector.broadcast %390 : vector<1x2xf32> to vector<6x2xf32>
    %392 = arith.addf %389, %391 : vector<6x2xf32>
    %c0_74 = arith.constant 0 : index
    %c0_75 = arith.constant 0 : index
    %393 = vector.load %arg11[%c0_74, %c0_75] : memref<6x2xf32, #tpu.memory_space<vmem>>, vector<6x2xf32>
    tpu.vector_store %arg11[%c0_74, %c0_75], %392 {strides = array<i32>} : memref<6x2xf32, #tpu.memory_space<vmem>>, vector<6x2xf32>,
    return
  }
  func.func @transform_0(%arg0: i32) -> (i32, i32) {
    %c0_i32 = arith.constant 0 : i32
    %c0_i32_0 = arith.constant 0 : i32
    %c0_i32_1 = arith.constant 0 : i32
    return %c0_i32, %c0_i32_0 : i32, i32
  }
  func.func @transform_1(%arg0: i32) -> (i32, i32) {
    %c0_i32 = arith.constant 0 : i32
    %c0_i32_0 = arith.constant 0 : i32
    %c0_i32_1 = arith.constant 0 : i32
    return %c0_i32, %c0_i32_0 : i32, i32
  }
  func.func @transform_2(%arg0: i32) -> (i32, i32) {
    %c0_i32 = arith.constant 0 : i32
    %c0_i32_0 = arith.constant 0 : i32
    %c0_i32_1 = arith.constant 0 : i32
    return %c0_i32, %c0_i32_0 : i32, i32
  }
  func.func @transform_3(%arg0: i32) -> (i32, i32) {
    %c0_i32 = arith.constant 0 : i32
    %c0_i32_0 = arith.constant 0 : i32
    %c0_i32_1 = arith.constant 0 : i32
    return %c0_i32, %c0_i32_0 : i32, i32
  }
  func.func @transform_4(%arg0: i32) -> (i32, i32) {
    %c0_i32 = arith.constant 0 : i32
    %c0_i32_0 = arith.constant 0 : i32
    %c0_i32_1 = arith.constant 0 : i32
    return %c0_i32, %c0_i32_0 : i32, i32
  }
  func.func @transform_5(%arg0: i32) -> (i32, i32) {
    %c0_i32 = arith.constant 0 : i32
    %c0_i32_0 = arith.constant 0 : i32
    %c0_i32_1 = arith.constant 0 : i32
    return %c0_i32, %c0_i32_0 : i32, i32
  }
  func.func @transform_6(%arg0: i32) -> (i32, i32) {
    %c0_i32 = arith.constant 0 : i32
    %c0_i32_0 = arith.constant 0 : i32
    %c0_i32_1 = arith.constant 0 : i32
    return %c0_i32, %c0_i32_0 : i32, i32
  }
  func.func @transform_7(%arg0: i32) -> (i32, i32) {
    %c0_i32 = arith.constant 0 : i32
    %c0_i32_0 = arith.constant 0 : i32
    %c0_i32_1 = arith.constant 0 : i32
    return %c0_i32, %c0_i32_0 : i32, i32
  }
  func.func @transform_8(%arg0: i32) -> (i32, i32) {
    %c0_i32 = arith.constant 0 : i32
    %c0_i32_0 = arith.constant 0 : i32
    %c0_i32_1 = arith.constant 0 : i32
    return %c0_i32, %c0_i32_0 : i32, i32
  }
  func.func @transform_9(%arg0: i32) -> (i32, i32) {
    %c0_i32 = arith.constant 0 : i32
    %c0_i32_0 = arith.constant 0 : i32
    %c0_i32_1 = arith.constant 0 : i32
    return %c0_i32, %c0_i32_0 : i32, i32
  }
  func.func @transform_10(%arg0: i32) -> (i32, i32) {
    %c0_i32 = arith.constant 0 : i32
    %c0_i32_0 = arith.constant 0 : i32
    %c0_i32_1 = arith.constant 0 : i32
    return %c0_i32, %c0_i32_0 : i32, i32
  }
}

</mosaic_0001>

<bundles_post_ra>
// kernel: mamba_head_forward.1
= control target key start
LH: loop header
LB: loop body
LE: loop exit
PB: predicated region body
PF: predicated region fallthrough
CT: control target
= control target key end

     0   :  { %vm46_vm0 = vcmask 261120   ;;  %vm53_vm1 = vcmask 257024   ;;  %v3190_v9 = vmov 0.0   ;;  %vm2351_vm2 = vmmov 0   ;;  %s2352_s14 = smov 32   ;;  %s2375_s19 = smov 64   ;;  %s3179_s0 = inlined_call_operand.vmem [shape: f32[20,32], index: 0, kind: input, shape index: {}]   ;;  %s3180_s2 = inlined_call_operand.vmem [shape: f32[32,128], index: 2, kind: input, shape index: {}]   ;;  %s3181_s1 = inlined_call_operand.vmem [shape: f32[2,32], index: 1, kind: input, shape index: {}]   ;;  %s3182_s4 = inlined_call_operand.vmem [shape: f32[3,64], index: 4, kind: input, shape index: {}]   ;;  %s3183_s5 = inlined_call_operand.vmem [shape: f32[64,96], index: 5, kind: input, shape index: {}]   ;;  %s3184_s3 = inlined_call_operand.vmem [shape: f32[4,64], index: 3, kind: input, shape index: {}]   ;;  %s3185_s6 = inlined_call_operand.vmem [shape: f32[16,64], index: 6, kind: input, shape index: {}]   ;;  %s3186_s7 = inlined_call_operand.vmem [shape: f32[64,32], index: 7, kind: input, shape index: {}]   ;;  %s3187_s8 = inlined_call_operand.vmem [shape: f32[32,2], index: 8, kind: input, shape index: {}]   ;;  %s3188_s9 = inlined_call_operand.vmem [shape: f32[1,2], index: 9, kind: input, shape index: {}]   ;;  %s3189_s10 = inlined_call_operand.vmem [shape: f32[6,2], index: 10, kind: output, shape index: {}]  }
   0x1   :  { %v35_v0 = vld [vmem:[%s3179_s0] sm:$0xff]  ;;  %v36_v1 = vld [vmem:[%s3179_s0 + $0x8] sm:$0xff]  ;;  %v37_v2 = vld [vmem:[%s3179_s0 + $0x10] sm:$0xf]  ;;  %2050 = vmatprep.subr.mxu0 %v3190_v9  ;;  %2058 = vmatprep.mubr.msk.f32.mxu0 %vm2351_vm2, %v3190_v9  ;;  %v170_v42 = vlaneseq  ;;  %vm181_vm3 = vcmask 1042432   ;;  %vm214_vm4 = vcmask 1041408  }
   0x2   :  { %v43_v3 = vmul.f32 %v35_v0, %v35_v0  ;;  %v44_v4 = vmul.f32 %v36_v1, %v36_v1  ;;  %v45_v5 = vmul.f32 %v37_v2, %v37_v2  ;;  %v80_v10 = vld [vmem:[%s3180_s2 + $0x18] sm:$0xff]  ;;  %v79_v11 = vld [vmem:[%s3180_s2 + $0x10] sm:$0xff]  ;;  %2067 = vmatprep.subr.mxu1 %v3190_v9  ;;  %v78_v12 = vld [vmem:[%s3180_s2 + $0x8] sm:$0xff]  ;;  %2083 = vmatprep.mubr.msk.f32.mxu1 %vm2351_vm2, %v3190_v9  ;;  %vm244_vm5 = vcmask 1040384  }
   0x3   :  { %2051 = vmatpush3.msra.mxu0 %v80_v10  ;;  %v77_v13 = vld [vmem:[%s3180_s2] sm:$0xff]  ;;  %v313_v34 = vld [vmem:[%s3183_s5 + $0x38] sm:$0xff]  ;;  %v312_v35 = vld [vmem:[%s3183_s5 + $0x30] sm:$0xff]  ;;  %v2512_v43 = vshrl.u32 %v170_v42, 7  ;;  %vm314_vm13 = vcmask 523264   ;;  %vm1237_vm14 = vcmask 130048  }
   0x4   :  { %v47_v6 = vsel %vm46_vm0, %v43_v3, 0.0  ;;  %v54_v7 = vsel %vm53_vm1, %v45_v5, 0.0  ;;  %v50_v8 = vsel %vm46_vm0, %v44_v4, 0.0  ;;  %2052 = vmatprep.subr.mxu0 %v3190_v9  ;;  %v1977_v24 = vld [vmem:[%s3181_s1] ss:$0 sm:$0xff]  ;;  %2068 = vmatpush3.msra.mxu1 %v313_v34  ;;  %v311_v36 = vld [vmem:[%s3183_s5 + $0x28] sm:$0xff] }
   0x5   :  { %48 = vadd.xlane.f32.xlu0 %v47_v6  ;;  %55 = vadd.xlane.f32.xlu1 %v54_v7  ;;  %v1989_v33 = vld [vmem:[%s3182_s4 + $0x1] ss:$0 sm:$0xff]  ;;  %v309_v38 = vld [vmem:[%s3183_s5 + $0x18] sm:$0xff]  ;;  %v308_v39 = vld [vmem:[%s3183_s5 + $0x10] sm:$0xff]  ;;  %v172_v44 = vadd.s32 8, %v2512_v43  ;;  %vm1310_vm15 = vcmask 516096  }
   0x6   :  { %2053 = vmatpush3.msra.mxu0 %v79_v11  ;;  %2069 = vmatprep.subr.mxu1 %v3190_v9  ;;  %v310_v37 = vld [vmem:[%s3183_s5 + $0x20] sm:$0xff]  ;;  %v307_v40 = vld [vmem:[%s3183_s5 + $0x8] sm:$0xff]  ;;  %vm1874_vm1 = vcmask 259072  }
   0x7   :  { %2054 = vmatprep.subr.mxu0 %v3190_v9  ;;  %2070 = vmatpush3.msra.mxu1 %v312_v35  ;;  %v306_v41 = vld [vmem:[%s3183_s5] sm:$0xff]  ;;  %vm192_vm6 = vcmp.ge.s32.totalorder %v172_v44, 10  ;;  %vm195_vm7 = vcmp.lt.s32.totalorder %v172_v44, 13  ;;  %vm225_vm8 = vcmp.lt.s32.totalorder %v172_v44, 12  ;;  %vm255_vm9 = vcmp.lt.s32.totalorder %v172_v44, 11 }
   0x8   :  { %2055 = vmatpush3.msra.mxu0 %v78_v12  ;;  %2071 = vmatprep.subr.mxu1 %v3190_v9  ;;  %v1982_v47 = vld [vmem:[%s3184_s3] ss:$0 sm:$0xff]  ;;  %v1983_v50 = vld [vmem:[%s3184_s3 + $0x1] ss:$0 sm:$0xff]  ;;  %v1984_v58 = vld [vmem:[%s3184_s3 + $0x2] ss:$0 sm:$0xff] }
   0x9   :  { %51 = vadd.xlane.f32.xlu0 %v50_v8  ;;  %2056 = vmatprep.subr.mxu0 %v3190_v9  ;;  %v1981_v54 = vld [vmem:[%s3182_s4] ss:$0 sm:$0xff]  ;;  %vm2531_vm10 = vmand %vm192_vm6, %vm195_vm7  ;;  %v1985_v3 = vld [vmem:[%s3184_s3 + $0x3] ss:$0 sm:$0xff] }
   0xa   :  { %2057 = vmatpush3.msra.mxu0 %v77_v13  ;;  %2072 = vmatpush3.msra.mxu1 %v311_v36  ;;  %vm2536_vm11 = vmand %vm192_vm6, %vm225_vm8 }
   0xb   :  { %2099 = vmatprep.subr.mxu0 %v3190_v9  ;;  %2073 = vmatprep.subr.mxu1 %v3190_v9  ;;  %vm2550_vm12 = vmand %vm192_vm6, %vm255_vm9 }
   0xc   :  { %2074 = vmatpush3.msra.mxu1 %v310_v37 }
   0xd   :  { %2075 = vmatprep.subr.mxu1 %v3190_v9 }
   0xe   :  { %2076 = vmatpush3.msra.mxu1 %v309_v38 }
   0xf   :  { %2077 = vmatprep.subr.mxu1 %v3190_v9 }
  0x10   :  { %2078 = vmatpush3.msra.mxu1 %v308_v39 }
  0x11   :  { %2079 = vmatprep.subr.mxu1 %v3190_v9 }
  0x12   :  { %2080 = vmatpush3.msra.mxu1 %v307_v40 }
  0x13   :  { %2081 = vmatprep.subr.mxu1 %v3190_v9 }
  0x14   :  { %2082 = vmatpush3.msra.mxu1 %v306_v41 }
  0x15   :  { %2092 = vmatprep.subr.mxu1 %v3190_v9 }
  0x16   :  { %409 = vrot.lane.b32.xlu1 %v1989_v33, %s2352_s14 }
  0x8e   :  { %v49_v14 = vpop.xlane.xlu0 %48  ;;  %v56_v16 = vpop.xlane.xlu1 %55 }
  0x8f   :  { %v58_v15 = vmul.f32 0.03125, %v49_v14  ;;  %v60_v17 = vmul.f32 0.03125, %v56_v16 }
  0x91   :  { %v61_v18 = vadd.f32 1e-05, %v58_v15  ;;  %v63_v20 = vadd.f32 1e-05, %v60_v17 }
  0x92   :  { %v52_v19 = vpop.xlane.xlu0 %51  ;;  %v410_v10 = vpop.permute.xlu1 %409 }
  0x93   :  { %2231 = vrsqrt.f32 %v61_v18  ;;  %v59_v21 = vmul.f32 0.03125, %v52_v19 }
  0x94   :  { %2233 = vrsqrt.f32 %v63_v20 }
  0x95   :  { %v62_v22 = vadd.f32 1e-05, %v59_v21 }
  0x97   :  { %2235 = vrsqrt.f32 %v62_v22 }
  0xa0   :  { %v2232_v23 = vpop.eup %2231 }
  0xa1   :  { %v67_v25 = vmul.f32 %v2232_v23, %v35_v0  ;;  %v2234_v26 = vpop.eup %2233 }
  0xa2   :  { %v69_v30 = vmul.f32 %v2234_v26, %v37_v2 }
  0xa3   :  { %v74_v27 = vmul.f32 %v1977_v24, %v67_v25 }
  0xa4   :  { %v2236_v28 = vpop.eup %2235  ;;  %v76_v32 = vmul.f32 %v1977_v24, %v69_v30 }
  0xa5   :  { %2059 = vmatmul.mubr.msk.f32.vlgmr.msra.gmra.mxu0 %vm46_vm0, %v74_v27  ;;  %v68_v29 = vmul.f32 %v2236_v28, %v36_v1 }
  0xa6   :  { %2061 = vmatprep.mubr.msk.f32.mxu0 %vm2351_vm2, %v3190_v9 }
  0xa7   :  { %v75_v31 = vmul.f32 %v1977_v24, %v68_v29 }
  0xa9   :  { %2062 = vmatmul.mubr.msk.f32.gmra.mxu0 %vm46_vm0, %v75_v31 }
  0xaa   :  { %2064 = vmatprep.mubr.msk.f32.mxu0 %vm2351_vm2, %v3190_v9 }
  0xad   :  { %2065 = vmatmul.mubr.msk.f32.gmra.mxu0 %vm46_vm0, %v76_v32 }
  0xae   :  { %2103 = vmatprep.mubr.msk.f32.mxu0 %vm2351_vm2, %v3190_v9 }
 0x165   :  { %v156_v45 = vpop.f32.mrf.mxu0 }
 0x166   :  { %v182_v46 = vrot.slane %v156_v45, 5  ;;  %v215_v48 = vrot.slane %v156_v45, 6  ;;  %v245_v49 = vrot.slane %v156_v45, 7  ;;  %v279_v16 = vmul.f32 %v1985_v3, %v156_v45 }
 0x167   :  { %v2060_v51 = vpop.f32.mrf.mxu0 }
 0x168   :  { %v190_v52 = vsel %vm181_vm3, 0.0, %v182_v46  ;;  %v223_v53 = vsel %vm214_vm4, 0.0, %v215_v48  ;;  %v253_v57 = vsel %vm244_vm5, 0.0, %v245_v49 }
 0x169   :  { %v208_v55 = vmul.f32 %v1982_v47, %v190_v52  ;;  %v161_v56 = vpop.f32.mrf.mxu0  ;;  %v238_v63 = vmul.f32 %v1983_v50, %v223_v53  ;;  %v268_v6 = vmul.f32 %v1984_v58, %v253_v57  ;;  %v42_v57 = vld [vmem:[%s3182_s4 + $0x2] sm:$0x1]  ;;  %s2353_s4 = smov 112  }
 0x16a   :  { %v183_v59 = vrot.slane %v161_v56, 5  ;;  %v216_v61 = vrot.slane %v161_v56, 6  ;;  %v246_v62 = vrot.slane %v161_v56, 7  ;;  %v280_v34 = vmul.f32 %v1985_v3, %v161_v56 }
 0x16b   :  { %v2063_v1 = vpop.f32.mrf.mxu0  ;;  %v211_v2 = vadd.f32 %v1981_v54, %v208_v55 }
 0x16c   :  { %v184_v4 = vsel %vm181_vm3, %v182_v46, %v183_v59  ;;  %v217_v5 = vsel %vm214_vm4, %v215_v48, %v216_v61  ;;  %v247_v8 = vsel %vm244_vm5, %v245_v49, %v246_v62 }
 0x16d   :  { %v201_v7 = vsel %vm2531_vm10, 0.0, %v184_v4  ;;  %v166_v11 = vpop.f32.mrf.mxu0  ;;  %v241_v12 = vadd.f32 %v238_v63, %v211_v2  ;;  %v231_v13 = vsel %vm2536_vm11, 0.0, %v217_v5  ;;  %v261_v21 = vsel %vm2550_vm12, 0.0, %v247_v8 }
 0x16e   :  { %v185_v14 = vrot.slane %v166_v11, 5  ;;  %v218_v15 = vrot.slane %v166_v11, 6  ;;  %v248_v17 = vrot.slane %v166_v11, 7  ;;  %v209_v19 = vmul.f32 %v1982_v47, %v201_v7 }
 0x16f   :  { %v2066_v18 = vpop.f32.mrf.mxu0  ;;  %v271_v20 = vadd.f32 %v268_v6, %v241_v12  ;;  %v239_v25 = vmul.f32 %v1983_v50, %v231_v13  ;;  %v269_v30 = vmul.f32 %v1984_v58, %v261_v21  ;;  %v281_v37 = vmul.f32 %v1985_v3, %v166_v11 }
 0x170   :  { %v186_v22 = vsel %vm181_vm3, %v183_v59, %v185_v14  ;;  %v219_v23 = vsel %vm214_vm4, %v216_v61, %v218_v15  ;;  %v2561_v24 = vsel %vm181_vm3, %v247_v8, %v218_v15  ;;  %v212_v27 = vadd.f32 %v1981_v54, %v209_v19 }
 0x171   :  { %v210_v26 = vmul.f32 %v1982_v47, %v186_v22  ;;  %v249_v28 = vsel %vm244_vm5, %v246_v62, %v248_v17  ;;  %v282_v29 = vadd.f32 %v279_v16, %v271_v20  ;;  %v240_v31 = vmul.f32 %v1983_v50, %v219_v23 }
 0x172   :  { %v242_v33 = vadd.f32 %v239_v25, %v212_v27  ;;  %v270_v36 = vmul.f32 %v1984_v58, %v249_v28 }
 0x173   :  { %v213_v32 = vadd.f32 %v1981_v54, %v210_v26  ;;  %v285_v35 = vsub.f32 0.0, %v282_v29 }
 0x174   :  { %v272_v39 = vadd.f32 %v269_v30, %v242_v33 }
 0x175   :  { %v243_v38 = vadd.f32 %v240_v31, %v213_v32  ;;  %v288_v40 = vmul.f32 1.442695, %v285_v35 }
 0x176   :  { %v283_v42 = vadd.f32 %v280_v34, %v272_v39  ;;  %v2354_v39 = vmov 0  }
 0x177   :  { %v273_v41 = vadd.f32 %v270_v36, %v243_v38  ;;  %2237 = vpow2.f32 %v288_v40  ;;  %2190 = vset.pattern.permute.xlu1 %v2354_v39 }
 0x178   :  { %v286_v44 = vsub.f32 0.0, %v283_v42 }
 0x179   :  { %v284_v45 = vadd.f32 %v281_v37, %v273_v41 }
 0x17a   :  { %v290_v46 = vmul.f32 1.442695, %v286_v44  ;;  %v2606_v44 = vsub.s32 0, %v2512_v43 }
 0x17b   :  { %v287_v47 = vsub.f32 0.0, %v284_v45 }
 0x17c   :  { %2239 = vpow2.f32 %v290_v46 }
 0x17d   :  { %v292_v48 = vmul.f32 1.442695, %v287_v47 }
 0x17f   :  { %2241 = vpow2.f32 %v292_v48 }
 0x184   :  { %v2238_v49 = vpop.eup %2237 }
 0x185   :  { %v294_v50 = vadd.f32 1.0, %v2238_v49 }
 0x187   :  { %2243 = vrcp.f32 %v294_v50 }
 0x189   :  { %v2240_v51 = vpop.eup %2239 }
 0x18a   :  { %v295_v52 = vadd.f32 1.0, %v2240_v51  ;;  %v2616_v51 = vsub.s32 2, %v2512_v43 }
 0x18c   :  { %v2242_v53 = vpop.eup %2241  ;;  %2245 = vrcp.f32 %v295_v52  ;;  %v2619_v52 = vsub.s32 7, %v2512_v43 }
 0x18d   :  { %v296_v54 = vadd.f32 1.0, %v2242_v53  ;;  %v2622_v53 = vsub.s32 1, %v2512_v43 }
 0x18f   :  { %2247 = vrcp.f32 %v296_v54 }
 0x194   :  { %v2244_v55 = vpop.eup %2243 }
 0x195   :  { %v303_v56 = vmul.f32 %v2244_v55, %v282_v29 }
 0x197   :  { %444 = vrot.lane.b32.xlu1 %v303_v56, %s2352_s14  ;;  %2084 = vmatmul.mubr.msk.f32.vlgmr.msra.gmra.mxu1 %vm314_vm13, %v303_v56  ;;  %v1230_v58 = vrot.slane %v303_v56, 7 }
 0x198   :  { %2086 = vmatprep.mubr.msk.f32.mxu1 %vm2351_vm2, %v3190_v9 }
 0x199   :  { %v2246_v59 = vpop.eup %2245  ;;  %v2571_v60 = vmul.f32 %v1230_v58, %v42_v57 }
 0x19a   :  { %v304_v61 = vmul.f32 %v2246_v59, %v283_v42 }
 0x19c   :  { %v2248_v62 = vpop.eup %2247  ;;  %446 = vrot.lane.b32.xlu1 %v304_v61, %s2352_s14  ;;  %2087 = vmatmul.mubr.msk.f32.gmra.mxu1 %vm314_vm13, %v304_v61  ;;  %v2575_v0 = vmul.f32 %v304_v61, %v42_v57  ;;  %v1596_v1 = vrot.slane %v304_v61, 1 }
 0x19d   :  { %v305_v63 = vmul.f32 %v2248_v62, %v284_v45  ;;  %2089 = vmatprep.mubr.msk.f32.mxu1 %vm2351_vm2, %v3190_v9 }
 0x19e   :  { %3203 = vst [vmem:[#allocation3_spill] sm:$0xff] %v2575_v0  ;;  %v2580_v4 = vmul.f32 %v1596_v1, %v42_v57 }
 0x19f   :  { %448 = vrot.lane.b32.xlu0 %v305_v63, %s2352_s14  ;;  %v1324_v2 = vrot.slane %v305_v63, 1  ;;  %v1505_v3 = vrot.slane %v305_v63, 2  ;;  %v1687_v5 = vrot.slane %v305_v63, 3  ;;  %s2355_s14 = smov 96  }
 0x1a0   :  { %3204 = vst [vmem:[#allocation4_spill] sm:$0xff] %v2580_v4  ;;  %2090 = vmatmul.mubr.msk.f32.gmra.mxu1 %vm314_vm13, %v305_v63 }
 0x1a1   :  { %v2583_v6 = vmul.f32 %v1324_v2, %v42_v57  ;;  %v2585_v7 = vmul.f32 %v1505_v3, %v42_v57  ;;  %v2587_v8 = vmul.f32 %v1687_v5, %v42_v57  ;;  %2096 = vmatprep.mubr.msk.f32.mxu1 %vm2351_vm2, %v3190_v9  ;;  %v532_v2 = vsub.s32 3, %v2512_v43 }
 0x1a2   :  { %v546_v3 = vsub.s32 4, %v2512_v43  ;;  %v560_v5 = vsub.s32 5, %v2512_v43 }
 0x1a3   :  { %3205 = vst [vmem:[#allocation5_spill] sm:$0xff] %v2583_v6  ;;  %3206 = vst [vmem:[#allocation6_spill] sm:$0xff] %v2585_v7  ;;  %v3210_v7 = vmov 17  }
 0x1a4   :  { %3207 = vst [vmem:[#allocation7_spill] sm:$0xff] %v2587_v8  ;;  %v3208_v8 = vmov 16  }
 0x209   :  { %v445_v48 = vpop.permute.xlu1 %444 }
 0x257   :  { %v390_v11 = vpop.f32.mrf.mxu1 }
 0x258   :  { %v412_v12 = vadd.f32 %v410_v10, %v390_v11  ;;  %v1234_v13 = vrot.slane %v390_v11, 7 }
 0x259   :  { %v2085_v14 = vpop.f32.mrf.mxu1 }
 0x25a   :  { %v418_v15 = vand.u32 2147483647, %v412_v12  ;;  %1235 = vrot.lane.b32.xlu0 %v1234_v13, %s2353_s4  ;;  %v415_v41 = vmax.f32 %v412_v12, 0.0 }
 0x25c   :  { %v421_v16 = vsub.f32 0.0, %v418_v15  ;;  %v2592_v17 = vpop.f32.mrf.mxu1 }
 0x25d   :  { %v413_v18 = vadd.f32 %v410_v10, %v2592_v17 }
 0x25e   :  { %v424_v19 = vmul.f32 1.442695, %v421_v16  ;;  %v2088_v20 = vpop.f32.mrf.mxu1  ;;  %1418 = vrot.lane.b32.xlu0 %v2592_v17, %s2353_s4 }
 0x25f   :  { %v419_v21 = vand.u32 2147483647, %v413_v18  ;;  %v416_v49 = vmax.f32 %v413_v18, 0.0  ;;  %v449_v18 = vpop.permute.xlu0 %448  ;;  %v574_v20 = vsub.s32 6, %v2512_v43 }
 0x260   :  { %2249 = vpow2.f32 %v424_v19  ;;  %v2597_v22 = vpop.f32.mrf.mxu1 }
 0x261   :  { %v422_v23 = vsub.f32 0.0, %v419_v21  ;;  %v414_v25 = vadd.f32 %v410_v10, %v2597_v22  ;;  %v1328_v26 = vrot.slane %v2597_v22, 1  ;;  %v1508_v31 = vrot.slane %v2597_v22, 2 }
 0x262   :  { %v2091_v27 = vpop.f32.mrf.mxu1 }
 0x263   :  { %v426_v28 = vmul.f32 1.442695, %v422_v23  ;;  %v420_v29 = vand.u32 2147483647, %v414_v25  ;;  %1329 = vrot.lane.b32.xlu1 %v1328_v26, %s2353_s4  ;;  %v417_v62 = vmax.f32 %v414_v25, 0.0 }
 0x265   :  { %2251 = vpow2.f32 %v426_v28  ;;  %v423_v30 = vsub.f32 0.0, %v420_v29 }
 0x267   :  { %v428_v32 = vmul.f32 1.442695, %v423_v30  ;;  %1509 = vrot.lane.b32.xlu1 %v1508_v31, %s2353_s4 }
 0x269   :  { %2253 = vpow2.f32 %v428_v32 }
 0x26d   :  { %v2250_v33 = vpop.eup %2249 }
 0x26e   :  { %v430_v34 = vadd.f32 1.0, %v2250_v33 }
 0x270   :  { %2255 = vlog2.f32 %v430_v34 }
 0x272   :  { %v2252_v35 = vpop.eup %2251 }
 0x273   :  { %v431_v36 = vadd.f32 1.0, %v2252_v35 }
 0x275   :  { %2257 = vlog2.f32 %v431_v36 }
 0x276   :  { %v2254_v37 = vpop.eup %2253 }
 0x277   :  { %v432_v38 = vadd.f32 1.0, %v2254_v37 }
 0x279   :  { %2259 = vlog2.f32 %v432_v38 }
 0x27c   :  { %456 = vxpose.xlu0.b32.start [1/3] (short) (narrow) %v390_v11, 16  ;;  %v447_v11 = vpop.permute.xlu1 %446 }
 0x27d   :  { %v2256_v40 = vpop.eup %2255 }
 0x27e   :  { %v434_v42 = vmul.f32 0.6931472, %v2256_v40 }
 0x280   :  { %v2608_v45 = vadd.f32 %v434_v42, %v415_v41  ;;  %457 = vxpose.xlu0.b32.cont [2/3] (short) (narrow) %v2592_v17, 16 }
 0x282   :  { %v2258_v46 = vpop.eup %2257  ;;  %v491_v47 = vrot.slane %v2608_v45, %v2606_v44  ;;  %v453_v54 = vmul.f32 %v445_v48, %v2608_v45 }
 0x283   :  { %v436_v50 = vmul.f32 0.6931472, %v2258_v46 }
 0x284   :  { %458 = vxpose.xlu0.b32.end [3/3] (short) (narrow) %v2597_v22, 16  ;;  %493 = vrot.lane.b32.xlu1 %v491_v47, %s2355_s14  ;;  %v2628_v57 = vrot.slane %v453_v54, %v2606_v44  ;;  %v2631_v58 = vrot.slane %v453_v54, %v2619_v52  ;;  %v2634_v59 = vrot.slane %v453_v54, %v2622_v53 }
 0x285   :  { %v2625_v55 = vadd.f32 %v436_v50, %v416_v49  ;;  %v2637_v61 = vrot.slane %v453_v54, %v2616_v51  ;;  %v2648_v14 = vrot.slane %v453_v54, %v560_v5  ;;  %v2650_v15 = vrot.slane %v453_v54, %v532_v2 }
 0x286   :  { %v2260_v56 = vpop.eup %2259  ;;  %v2652_v16 = vrot.slane %v453_v54, %v546_v3  ;;  %v2683_v34 = vrot.slane %v453_v54, %v574_v20  ;;  %v505_v47 = vrot.slane %v2608_v45, %v2622_v53  ;;  %v2356_v49 = vmov 15  }
 0x287   :  { %v438_v63 = vmul.f32 0.6931472, %v2260_v56  ;;  %v631_v1 = vrot.slane %v2625_v55, %v2616_v51  ;;  %v603_v10 = vrot.slane %v2625_v55, %v2606_v44  ;;  %v454_v13 = vmul.f32 %v447_v11, %v2625_v55 }
 0x288   :  { %v645_v19 = vrot.slane %v2625_v55, %v532_v2  ;;  %v659_v33 = vrot.slane %v2625_v55, %v546_v3  ;;  %v673_v37 = vrot.slane %v2625_v55, %v560_v5  ;;  %v687_v38 = vrot.slane %v2625_v55, %v574_v20 }
 0x289   :  { %v441_v12 = vadd.f32 %v438_v63, %v417_v62  ;;  %633 = vrot.lane.b32.xlu1 %v631_v1, %s2355_s14  ;;  %v2657_v21 = vrot.slane %v454_v13, %v2619_v52  ;;  %v2660_v25 = vrot.slane %v454_v13, %v2616_v51  ;;  %v2662_v26 = vrot.slane %v454_v13, %v532_v2 }
 0x28a   :  { %v2665_v27 = vrot.slane %v454_v13, %v546_v3  ;;  %v2668_v28 = vrot.slane %v454_v13, %v2622_v53  ;;  %v2670_v29 = vrot.slane %v454_v13, %v560_v5  ;;  %v2680_v32 = vrot.slane %v454_v13, %v574_v20 }
 0x28b   :  { %v455_v23 = vmul.f32 %v449_v18, %v441_v12  ;;  %v2689_v36 = vrot.slane %v454_v13, %v2606_v44  ;;  %v701_v40 = vrot.slane %v2625_v55, %v2619_v52  ;;  %v715_v41 = vrot.slane %v441_v12, %v2606_v44 }
 0x28c   :  { %v729_v42 = vrot.slane %v441_v12, %v2622_v53  ;;  %v743_v46 = vrot.slane %v441_v12, %v2616_v51  ;;  %v757_v48 = vrot.slane %v441_v12, %v532_v2  ;;  %v533_v50 = vrot.slane %v2608_v45, %v532_v2 }
 0x28d   :  { %647 = vrot.lane.b32.xlu1 %v645_v19, %s2355_s14  ;;  %v2673_v43 = vrot.slane %v455_v23, %v2606_v44  ;;  %v2675_v30 = vrot.slane %v455_v23, %v532_v2  ;;  %v2678_v31 = vrot.slane %v455_v23, %v2616_v51  ;;  %v2686_v35 = vrot.slane %v455_v23, %v2622_v53 }
 0x28e   :  { %v519_v44 = vrot.slane %v2608_v45, %v2616_v51  ;;  %v547_v54 = vrot.slane %v2608_v45, %v546_v3  ;;  %v561_v56 = vrot.slane %v2608_v45, %v560_v5  ;;  %v575_v62 = vrot.slane %v2608_v45, %v574_v20 }
 0x28f   :  { %v589_v51 = vrot.slane %v2608_v45, %v2619_v52  ;;  %v617_v63 = vrot.slane %v2625_v55, %v2622_v53  ;;  %v3196_v45 = vmov 16   ;;  %v2358_v52 = vmov 10  }
 0x290   :  { %v3195_v53 = vmov 7   ;;  %v2360_v55 = vmov 1   ;;  %v3192_v5 = vmov 19   ;;  %v2363_v12 = vmov 2  }
 0x291   :  { %661 = vrot.lane.b32.xlu1 %v659_v33, %s2355_s14  ;;  %v2364_v13 = vmov 5   ;;  %v2365_v18 = vmov 12   ;;  %v2366_v19 = vmov 18   ;;  %v2367_v20 = vmov 3  }
 0x292   :  { %v2368_v23 = vmov 9   ;;  %v2369_v33 = vmov 13  }
 0x295   :  { %675 = vrot.lane.b32.xlu1 %v673_v37, %s2355_s14  ;;  %v2370_v37 = vmov 4  }
 0x299   :  { %689 = vrot.lane.b32.xlu1 %v687_v38, %s2355_s14  ;;  %v2371_v38 = vmov 14  }
 0x29d   :  { %703 = vrot.lane.b32.xlu1 %v701_v40, %s2355_s14 }
 0x2a1   :  { %717 = vrot.lane.b32.xlu1 %v715_v41, %s2355_s14  ;;  %v2372_v41 = vmov 6  }
 0x2a5   :  { %731 = vrot.lane.b32.xlu1 %v729_v42, %s2355_s14 }
 0x2a9   :  { %745 = vrot.lane.b32.xlu1 %v743_v46, %s2355_s14 }
 0x2ad   :  { %507 = vrot.lane.b32.xlu0 %v505_v47, %s2355_s14  ;;  %759 = vrot.lane.b32.xlu1 %v757_v48, %s2355_s14  ;;  %v3194_v47 = vmov 17   ;;  %v3193_v48 = vmov 8  }
 0x2ae   :  { %2201 = vset.pattern.permute.xlu0 %v2356_v49 }
 0x2b1   :  { %521 = vrot.lane.b32.xlu0 %v519_v44, %s2355_s14 }
 0x2b5   :  { %535 = vrot.lane.b32.xlu0 %v533_v50, %s2355_s14 }
 0x2b9   :  { %549 = vrot.lane.b32.xlu0 %v547_v54, %s2355_s14 }
 0x2bd   :  { %563 = vrot.lane.b32.xlu0 %v561_v56, %s2355_s14 }
 0x2c1   :  { %577 = vrot.lane.b32.xlu0 %v575_v62, %s2355_s14 }
 0x2c5   :  { %591 = vrot.lane.b32.xlu0 %v589_v51, %s2355_s14 }
 0x2c9   :  { %605 = vrot.lane.b32.xlu0 %v603_v10, %s2355_s14  ;;  %v2362_v10 = vmov 11  }
 0x2cc   :  { %v2728_v1 = vpop.permute.xlu0 %1235 }
 0x2cd   :  { %619 = vrot.lane.b32.xlu0 %v617_v63, %s2355_s14 }
 0x2d0   :  { %v2730_v2 = vpop.permute.xlu0 %1418 }
 0x2d5   :  { %v2761_v40 = vpop.permute.xlu1 %1329 }
 0x2d9   :  { %v2764_v42 = vpop.permute.xlu1 %1509 }
 0x2f6   :  { %v2767_v46 = vpop.permute.xlu1 %493 }
 0x2f8   :  { %v2732_v3 = vpop.trf.xlu0 }
 0x2f9   :  { %981 = vperm.xlu0 %2201, %v2732_v3   ;;  %770 = vperm.xlu1 %2190, %v2732_v3  }
 0x2fb   :  { %v2772_v44 = vpop.permute.xlu1 %633 }
 0x2fc   :  { %v2748_v11 = vpop.trf.xlu0 }
 0x2fd   :  { %2203 = vset.pattern.permute.xlu0 %v3196_v45  ;;  %2191 = vset.pattern.permute.xlu1 %v2358_v52 }
 0x2fe   :  { %995 = vperm.xlu0 %2203, %v2732_v3   ;;  %911 = vperm.xlu1 %2191, %v2732_v3  }
 0x2ff   :  { %v2776_v50 = vpop.permute.xlu1 %647 }
 0x302   :  { %2204 = vset.pattern.permute.xlu0 %v3195_v53  ;;  %2192 = vset.pattern.permute.xlu1 %v2360_v55 }
 0x303   :  { %869 = vperm.xlu0 %2204, %v2732_v3   ;;  %785 = vperm.xlu1 %2192, %v2732_v3   ;;  %v2781_v56 = vpop.permute.xlu1 %661 }
 0x307   :  { %2209 = vset.pattern.permute.xlu0 %v3192_v5  ;;  %2193 = vset.pattern.permute.xlu1 %v2362_v10  ;;  %v2787_v51 = vpop.permute.xlu1 %675 }
 0x308   :  { %1037 = vperm.xlu0 %2209, %v2732_v3   ;;  %925 = vperm.xlu1 %2193, %v2732_v3  }
 0x30c   :  { %2214 = vset.pattern.permute.xlu0 %v2363_v12  ;;  %2194 = vset.pattern.permute.xlu1 %v2363_v12  ;;  %v2793_v12 = vpop.permute.xlu1 %689 }
 0x30d   :  { %803 = vperm.xlu0 %2214, %v2748_v11   ;;  %799 = vperm.xlu1 %2194, %v2732_v3  }
 0x311   :  { %2220 = vset.pattern.permute.xlu0 %v2364_v13  ;;  %2195 = vset.pattern.permute.xlu1 %v2365_v18 }
 0x312   :  { %845 = vperm.xlu0 %2220, %v2748_v11   ;;  %939 = vperm.xlu1 %2195, %v2732_v3  }
 0x316   :  { %2227 = vset.pattern.permute.xlu0 %v2366_v19  ;;  %2196 = vset.pattern.permute.xlu1 %v2367_v20 }
 0x317   :  { %1027 = vperm.xlu0 %2227, %v2748_v11   ;;  %813 = vperm.xlu1 %2196, %v2732_v3  }
 0x31b   :  { %2228 = vset.pattern.permute.xlu0 %v2368_v23  ;;  %2197 = vset.pattern.permute.xlu1 %v2369_v33 }
 0x31c   :  { %901 = vperm.xlu0 %2228, %v2748_v11   ;;  %953 = vperm.xlu1 %2197, %v2732_v3  }
 0x31f   :  { %v2778_v54 = vpop.permute.xlu0 %507 }
 0x320   :  { %2198 = vset.pattern.permute.xlu1 %v2370_v37  ;;  %2230 = vset.pattern.permute.xlu0 %v3192_v5 }
 0x321   :  { %827 = vperm.xlu1 %2198, %v2732_v3  }
 0x323   :  { %v2783_v62 = vpop.permute.xlu0 %521 }
 0x325   :  { %2199 = vset.pattern.permute.xlu1 %v2371_v38 }
 0x326   :  { %967 = vperm.xlu1 %2199, %v2732_v3  }
 0x327   :  { %v2789_v63 = vpop.permute.xlu0 %535 }
 0x32a   :  { %2200 = vset.pattern.permute.xlu1 %v2364_v13 }
 0x32b   :  { %841 = vperm.xlu1 %2200, %v2732_v3   ;;  %v2795_v13 = vpop.permute.xlu0 %549 }
 0x32f   :  { %2202 = vset.pattern.permute.xlu1 %v2372_v41 }
 0x330   :  { %855 = vperm.xlu1 %2202, %v2732_v3  }
 0x334   :  { %2205 = vset.pattern.permute.xlu1 %v3194_v47 }
 0x335   :  { %1009 = vperm.xlu1 %2205, %v2732_v3  }
 0x339   :  { %2206 = vset.pattern.permute.xlu1 %v3193_v48 }
 0x33a   :  { %883 = vperm.xlu1 %2206, %v2732_v3  }
 0x33e   :  { %2207 = vset.pattern.permute.xlu1 %v2366_v19 }
 0x33f   :  { %1023 = vperm.xlu1 %2207, %v2732_v3  }
 0x343   :  { %2208 = vset.pattern.permute.xlu1 %v2368_v23 }
 0x344   :  { %897 = vperm.xlu1 %2208, %v2732_v3   ;;  %v2802_v3 = vpop.permute.xlu0 %563 }
 0x348   :  { %2210 = vset.pattern.permute.xlu1 %v2354_v39  ;;  %v2800_v39 = vpop.permute.xlu1 %703  ;;  %v2808_v19 = vpop.permute.xlu0 %577 }
 0x349   :  { %775 = vperm.xlu1 %2210, %v2748_v11  }
 0x34c   :  { %v2813_v23 = vpop.permute.xlu0 %591 }
 0x34d   :  { %2211 = vset.pattern.permute.xlu1 %v2358_v52  ;;  %v2806_v52 = vpop.permute.xlu1 %717 }
 0x34e   :  { %915 = vperm.xlu1 %2211, %v2748_v11  }
 0x350   :  { %v2818_v9 = vpop.permute.xlu0 %605 }
 0x352   :  { %2212 = vset.pattern.permute.xlu1 %v2360_v55  ;;  %v2811_v55 = vpop.permute.xlu1 %731 }
 0x353   :  { %789 = vperm.xlu1 %2212, %v2748_v11  }
 0x354   :  { %v2823_v5 = vpop.permute.xlu0 %619 }
 0x357   :  { %2213 = vset.pattern.permute.xlu1 %v2362_v10  ;;  %v2816_v10 = vpop.permute.xlu1 %745 }
 0x358   :  { %929 = vperm.xlu1 %2213, %v2748_v11  }
 0x35c   :  { %2215 = vset.pattern.permute.xlu1 %v2365_v18  ;;  %v2821_v18 = vpop.permute.xlu1 %759 }
 0x35d   :  { %943 = vperm.xlu1 %2215, %v2748_v11  }
 0x361   :  { %2216 = vset.pattern.permute.xlu1 %v2367_v20 }
 0x362   :  { %817 = vperm.xlu1 %2216, %v2748_v11  }
 0x366   :  { %2217 = vset.pattern.permute.xlu1 %v2369_v33 }
 0x367   :  { %957 = vperm.xlu1 %2217, %v2748_v11  }
 0x36b   :  { %2218 = vset.pattern.permute.xlu1 %v2370_v37 }
 0x36c   :  { %831 = vperm.xlu1 %2218, %v2748_v11  }
 0x370   :  { %2219 = vset.pattern.permute.xlu1 %v2371_v38 }
 0x371   :  { %971 = vperm.xlu1 %2219, %v2748_v11  }
 0x374   :  { %v982_v20 = vpop.permute.xlu0 %981  ;;  %v771_v48 = vpop.permute.xlu1 %770 }
 0x375   :  { %v782_v33 = vmul.f32 %v2628_v57, %v771_v48  ;;  %2221 = vset.pattern.permute.xlu1 %v2356_v49 }
 0x376   :  { %985 = vperm.xlu1 %2221, %v2748_v11  }
 0x377   :  { %1054 = vrot.lane.b32.xlu0 %v782_v33, %s2355_s14  ;;  %v3209_v33 = vmov 7  }
 0x379   :  { %v996_v37 = vpop.permute.xlu0 %995  ;;  %v912_v47 = vpop.permute.xlu1 %911 }
 0x37a   :  { %2222 = vset.pattern.permute.xlu1 %v2372_v41 }
 0x37b   :  { %859 = vperm.xlu1 %2222, %v2748_v11  }
 0x37e   :  { %v870_v53 = vpop.permute.xlu0 %869  ;;  %v786_v45 = vpop.permute.xlu1 %785 }
 0x37f   :  { %v796_v38 = vmul.f32 %v2634_v59, %v786_v45  ;;  %2223 = vset.pattern.permute.xlu1 %v3208_v8  ;;  %v3211_v45 = vmov 8  }
 0x380   :  { %999 = vperm.xlu1 %2223, %v2748_v11  }
 0x381   :  { %1078 = vrot.lane.b32.xlu0 %v796_v38, %s2355_s14 }
 0x383   :  { %v1038_v49 = vpop.permute.xlu0 %1037  ;;  %v926_v48 = vpop.permute.xlu1 %925 }
 0x384   :  { %v2836_v4 = vmul.f32 %v2675_v30, %v1038_v49  ;;  %2224 = vset.pattern.permute.xlu1 %v3209_v33  ;;  %v3212_v33 = vmov 19  }
 0x385   :  { %873 = vperm.xlu1 %2224, %v2748_v11  }
 0x388   :  { %v800_v41 = vpop.permute.xlu1 %799 }
 0x389   :  { %v810_v0 = vmul.f32 %v2637_v61, %v800_v41  ;;  %2225 = vset.pattern.permute.xlu1 %v3210_v7  ;;  %v922_v7 = vmul.f32 %v2660_v25, %v912_v47 }
 0x38a   :  { %1013 = vperm.xlu1 %2225, %v2748_v11  }
 0x38b   :  { %1102 = vrot.lane.b32.xlu0 %v810_v0, %s2355_s14  ;;  %v936_v0 = vmul.f32 %v2662_v26, %v926_v48 }
 0x38d   :  { %v940_v8 = vpop.permute.xlu1 %939 }
 0x38e   :  { %2226 = vset.pattern.permute.xlu1 %v3211_v45 }
 0x38f   :  { %887 = vperm.xlu1 %2226, %v2748_v11  }
 0x392   :  { %v814_v38 = vpop.permute.xlu1 %813 }
 0x393   :  { %v824_v49 = vmul.f32 %v2650_v15, %v814_v38  ;;  %2229 = vset.pattern.permute.xlu1 %v3212_v33  ;;  %v950_v38 = vmul.f32 %v2665_v27, %v940_v8  ;;  %v992_v8 = vmul.f32 %v2657_v21, %v982_v20 }
 0x394   :  { %1041 = vperm.xlu1 %2229, %v2748_v11  }
 0x395   :  { %1126 = vrot.lane.b32.xlu0 %v824_v49, %s2355_s14 }
 0x397   :  { %v954_v41 = vpop.permute.xlu1 %953 }
 0x398   :  { %1066 = vrot.lane.b32.xlu1 %v922_v7, %s2355_s14  ;;  %v964_v49 = vmul.f32 %v2670_v29, %v954_v41  ;;  %v1006_v41 = vmul.f32 %v2673_v43, %v996_v37 }
 0x39c   :  { %1090 = vrot.lane.b32.xlu1 %v936_v0, %s2355_s14  ;;  %v828_v45 = vpop.permute.xlu1 %827  ;;  %v880_v0 = vmul.f32 %v2631_v58, %v870_v53 }
 0x39d   :  { %v838_v6 = vmul.f32 %v2652_v16, %v828_v45 }
 0x39f   :  { %1150 = vrot.lane.b32.xlu0 %v838_v6, %s2355_s14 }
 0x3a0   :  { %1114 = vrot.lane.b32.xlu1 %v950_v38, %s2355_s14 }
 0x3a1   :  { %v968_v11 = vpop.permute.xlu1 %967 }
 0x3a2   :  { %v978_v47 = vmul.f32 %v2680_v32, %v968_v11 }
 0x3a4   :  { %1138 = vrot.lane.b32.xlu1 %v964_v49, %s2355_s14 }
 0x3a6   :  { %v842_v33 = vpop.permute.xlu1 %841 }
 0x3a7   :  { %v852_v48 = vmul.f32 %v2648_v14, %v842_v33 }
 0x3a8   :  { %1162 = vrot.lane.b32.xlu1 %v978_v47, %s2355_s14 }
 0x3a9   :  { %1174 = vrot.lane.b32.xlu0 %v852_v48, %s2355_s14 }
 0x3ab   :  { %v856_v7 = vpop.permute.xlu1 %855 }
 0x3ac   :  { %v866_v6 = vmul.f32 %v2683_v34, %v856_v7  ;;  %1186 = vrot.lane.b32.xlu1 %v992_v8, %s2355_s14 }
 0x3ae   :  { %1198 = vrot.lane.b32.xlu0 %v866_v6, %s2355_s14 }
 0x3b0   :  { %v1010_v45 = vpop.permute.xlu1 %1009  ;;  %1210 = vrot.lane.b32.xlu1 %v1006_v41, %s2355_s14 }
 0x3b1   :  { %v1020_v38 = vmul.f32 %v2686_v35, %v1010_v45  ;;  %v2889_v45 = vld [vmem:[%s3185_s6] sm:$0xff] }
 0x3b2   :  { %1222 = vrot.lane.b32.xlu0 %v880_v0, %s2355_s14  ;;  %v804_v0 = vpop.permute.xlu0 %803 }
 0x3b4   :  { %1316 = vrot.lane.b32.xlu1 %v1020_v38, %s2355_s14 }
 0x3b5   :  { %v884_v20 = vpop.permute.xlu1 %883 }
 0x3b6   :  { %v894_v11 = vmul.f32 %v2689_v36, %v884_v20  ;;  %v496_v20 = vmul.f32 %v2767_v46, %v2889_v45 }
 0x3b8   :  { %1408 = vrot.lane.b32.xlu0 %v894_v11, %s2355_s14 }
 0x3ba   :  { %v1024_v49 = vpop.permute.xlu1 %1023 }
 0x3bb   :  { %v1034_v37 = vmul.f32 %v2678_v31, %v1024_v49 }
 0x3bd   :  { %1497 = vrot.lane.b32.xlu1 %v1034_v37, %s2355_s14  ;;  %v846_v37 = vpop.permute.xlu0 %845 }
 0x3bf   :  { %v898_v53 = vpop.permute.xlu1 %897 }
 0x3c0   :  { %v2879_v47 = vmul.f32 %v2668_v28, %v898_v53 }
 0x3c4   :  { %v776_v33 = vpop.permute.xlu1 %775 }
 0x3c5   :  { %v783_v48 = vmul.f32 %v2628_v57, %v776_v33  ;;  %v811_v57 = vmul.f32 %v2637_v61, %v804_v0  ;;  %v510_v61 = vmul.f32 %v2778_v54, %v2889_v45 }
 0x3c7   :  { %1056 = vrot.lane.b32.xlu0 %v783_v48, %s2355_s14  ;;  %v512_v48 = vmul.f32 1.442695, %v510_v61 }
 0x3c9   :  { %v916_v8 = vpop.permute.xlu1 %915 }
 0x3ca   :  { %v923_v7 = vmul.f32 %v2660_v25, %v916_v8  ;;  %v2906_v8 = vpop.permute.xlu0 %1027 }
 0x3cc   :  { %1068 = vrot.lane.b32.xlu1 %v923_v7, %s2355_s14 }
 0x3ce   :  { %v790_v6 = vpop.permute.xlu1 %789 }
 0x3cf   :  { %v797_v41 = vmul.f32 %v2634_v59, %v790_v6  ;;  %v498_v59 = vmul.f32 1.442695, %v496_v20 }
 0x3d1   :  { %1080 = vrot.lane.b32.xlu0 %v797_v41, %s2355_s14  ;;  %2261 = vpow2.f32 %v498_v59  ;;  %v2910_v41 = vpop.permute.xlu0 %901 }
 0x3d2   :  { %2263 = vpow2.f32 %v512_v48 }
 0x3d3   :  { %v930_v38 = vpop.permute.xlu1 %929 }
 0x3d4   :  { %v937_v25 = vmul.f32 %v2662_v26, %v930_v38  ;;  %v524_v26 = vmul.f32 %v2783_v62, %v2889_v45  ;;  %v538_v38 = vmul.f32 %v2789_v63, %v2889_v45 }
 0x3d5   :  { %1104 = vrot.lane.b32.xlu0 %v811_v57, %s2355_s14 }
 0x3d6   :  { %1092 = vrot.lane.b32.xlu1 %v937_v25, %s2355_s14  ;;  %v526_v6 = vmul.f32 1.442695, %v524_v26  ;;  %v853_v25 = vmul.f32 %v2648_v14, %v846_v37  ;;  %v552_v37 = vmul.f32 %v2795_v13, %v2889_v45 }
 0x3d8   :  { %v944_v11 = vpop.permute.xlu1 %943  ;;  %2265 = vpow2.f32 %v526_v6 }
 0x3d9   :  { %v951_v49 = vmul.f32 %v2665_v27, %v944_v11 }
 0x3db   :  { %1116 = vrot.lane.b32.xlu1 %v951_v49, %s2355_s14  ;;  %v540_v49 = vmul.f32 1.442695, %v538_v38 }
 0x3dd   :  { %v818_v53 = vpop.permute.xlu1 %817  ;;  %2267 = vpow2.f32 %v540_v49 }
 0x3de   :  { %v825_v33 = vmul.f32 %v2650_v15, %v818_v53  ;;  %v2262_v57 = vpop.eup %2261 }
 0x3df   :  { %v2264_v53 = vpop.eup %2263 }
 0x3e0   :  { %1128 = vrot.lane.b32.xlu0 %v825_v33, %s2355_s14 }
 0x3e2   :  { %v958_v7 = vpop.permute.xlu1 %957 }
 0x3e3   :  { %v965_v27 = vmul.f32 %v2670_v29, %v958_v7  ;;  %v1050_v29 = vmul.f32 0.0, %v2262_v57  ;;  %v554_v57 = vmul.f32 1.442695, %v552_v37 }
 0x3e5   :  { %1140 = vrot.lane.b32.xlu1 %v965_v27, %s2355_s14  ;;  %v2266_v27 = vpop.eup %2265 }
 0x3e7   :  { %v832_v0 = vpop.permute.xlu1 %831 }
 0x3e8   :  { %v839_v15 = vmul.f32 %v2652_v16, %v832_v0  ;;  %v1779_v16 = vsub.f32 0.0, %v2561_v24 }
 0x3e9   :  { %v1055_v20 = vpop.permute.xlu0 %1054 }
 0x3ea   :  { %1152 = vrot.lane.b32.xlu0 %v839_v15, %s2355_s14  ;;  %v1060_v61 = vadd.f32 %v1055_v20, %v1050_v29  ;;  %v1780_v14 = vmul.f32 1.442695, %v1779_v16 }
 0x3ec   :  { %v972_v59 = vpop.permute.xlu1 %971  ;;  %v1074_v26 = vmul.f32 %v2264_v53, %v1060_v61  ;;  %2269 = vpow2.f32 %v1780_v14 }
 0x3ed   :  { %v979_v11 = vmul.f32 %v2680_v32, %v972_v59  ;;  %2271 = vpow2.f32 %v554_v57  ;;  %v2268_v59 = vpop.eup %2267 }
 0x3ee   :  { %1176 = vrot.lane.b32.xlu0 %v853_v25, %s2355_s14  ;;  %v566_v25 = vmul.f32 %v2802_v3, %v2889_v45 }
 0x3ef   :  { %1164 = vrot.lane.b32.xlu1 %v979_v11, %s2355_s14 }
 0x3f0   :  { %v568_v61 = vmul.f32 1.442695, %v566_v25 }
 0x3f1   :  { %v986_v33 = vpop.permute.xlu1 %985 }
 0x3f2   :  { %v993_v48 = vmul.f32 %v2657_v21, %v986_v33  ;;  %2273 = vpow2.f32 %v568_v61 }
 0x3f3   :  { %v1079_v7 = vpop.permute.xlu0 %1078 }
 0x3f4   :  { %v1084_v32 = vadd.f32 %v1079_v7, %v1074_v26  ;;  %1188 = vrot.lane.b32.xlu1 %v993_v48, %s2355_s14  ;;  %v580_v26 = vmul.f32 %v2808_v19, %v2889_v45 }
 0x3f6   :  { %v860_v6 = vpop.permute.xlu1 %859  ;;  %v1098_v0 = vmul.f32 %v2266_v27, %v1084_v32 }
 0x3f7   :  { %v867_v15 = vmul.f32 %v2683_v34, %v860_v6  ;;  %v582_v6 = vmul.f32 1.442695, %v580_v26 }
 0x3f9   :  { %1200 = vrot.lane.b32.xlu0 %v867_v15, %s2355_s14  ;;  %v2270_v16 = vpop.eup %2269 }
 0x3fa   :  { %v1782_v48 = vadd.f32 1.0, %v2270_v16  ;;  %v2272_v14 = vpop.eup %2271 }
 0x3fb   :  { %v1000_v38 = vpop.permute.xlu1 %999 }
 0x3fc   :  { %v1007_v21 = vmul.f32 %v2673_v43, %v1000_v38  ;;  %2275 = vrcp.f32 %v1782_v48 }
 0x3fd   :  { %v1103_v20 = vpop.permute.xlu0 %1102  ;;  %2277 = vpow2.f32 %v582_v6 }
 0x3fe   :  { %v1108_v29 = vadd.f32 %v1103_v20, %v1098_v0  ;;  %1212 = vrot.lane.b32.xlu1 %v1007_v21, %s2355_s14  ;;  %v909_v0 = vmul.f32 %v2668_v28, %v2910_v41  ;;  %v1599_v41 = vrot.slane %v2592_v17, 1 }
 0x3ff   :  { %v2274_v21 = vpop.eup %2273 }
 0x400   :  { %v874_v11 = vpop.permute.xlu1 %873  ;;  %v1122_v49 = vmul.f32 %v2268_v59, %v1108_v29  ;;  %v1690_v59 = vrot.slane %v2597_v22, 3  ;;  %v2969_v22 = vld [vmem:[%s3185_s6 + $0x8] sm:$0xff] }
 0x401   :  { %v881_v34 = vmul.f32 %v2631_v58, %v874_v11  ;;  %v1035_v58 = vmul.f32 %v2678_v31, %v2906_v8 }
 0x403   :  { %1224 = vrot.lane.b32.xlu0 %v881_v34, %s2355_s14 }
 0x405   :  { %v1014_v53 = vpop.permute.xlu1 %1013 }
 0x406   :  { %v1021_v43 = vmul.f32 %v2686_v35, %v1014_v53  ;;  %v594_v35 = vmul.f32 %v2813_v23, %v2889_v45 }
 0x407   :  { %v1127_v33 = vpop.permute.xlu0 %1126 }
 0x408   :  { %v1132_v7 = vadd.f32 %v1127_v33, %v1122_v49  ;;  %1318 = vrot.lane.b32.xlu1 %v1021_v43, %s2355_s14  ;;  %v596_v8 = vmul.f32 1.442695, %v594_v35 }
 0x409   :  { %v2276_v29 = vpop.eup %2275 }
 0x40a   :  { %v888_v37 = vpop.permute.xlu1 %887  ;;  %v1146_v32 = vmul.f32 %v2272_v14, %v1132_v7  ;;  %2279 = vpow2.f32 %v596_v8  ;;  %v1785_v49 = vmul.f32 %v2276_v29, %v2561_v24  ;;  %v2278_v61 = vpop.eup %2277  ;;  %v497_v24 = vmul.f32 %v2767_v46, %v2969_v22 }
 0x40b   :  { %v895_v27 = vmul.f32 %v2689_v36, %v888_v37  ;;  %v608_v36 = vmul.f32 %v2818_v9, %v2889_v45  ;;  %v511_v46 = vmul.f32 %v2778_v54, %v2969_v22  ;;  %v539_v54 = vmul.f32 %v2789_v63, %v2969_v22 }
 0x40c   :  { %1499 = vrot.lane.b32.xlu1 %v1035_v58, %s2355_s14  ;;  %v636_v58 = vmul.f32 %v2772_v44, %v2889_v45  ;;  %v664_v29 = vmul.f32 %v2781_v56, %v2889_v45 }
 0x40d   :  { %1410 = vrot.lane.b32.xlu0 %v895_v27, %s2355_s14  ;;  %v610_v25 = vmul.f32 1.442695, %v608_v36  ;;  %v650_v36 = vmul.f32 %v2776_v50, %v2889_v45 }
 0x40e   :  { %v638_v35 = vmul.f32 1.442695, %v636_v58 }
 0x40f   :  { %v1042_v15 = vpop.permute.xlu1 %1041  ;;  %2281 = vpow2.f32 %v610_v25 }
 0x410   :  { %v1049_v31 = vmul.f32 %v2675_v30, %v1042_v15  ;;  %v622_v30 = vmul.f32 %v2823_v5, %v2889_v45 }
 0x411   :  { %v1151_v57 = vpop.permute.xlu0 %1150  ;;  %1590 = vrot.lane.b32.xlu0 %v909_v0, %s2355_s14 }
 0x412   :  { %v1156_v38 = vadd.f32 %v1151_v57, %v1146_v32  ;;  %1681 = vrot.lane.b32.xlu1 %v1049_v31, %s2355_s14  ;;  %v624_v11 = vmul.f32 1.442695, %v622_v30  ;;  %v500_v32 = vmul.f32 1.442695, %v497_v24  ;;  %v514_v57 = vmul.f32 1.442695, %v511_v46 }
 0x413   :  { %v2953_v28 = vpop.permute.xlu1 %1066 }
 0x414   :  { %v1170_v20 = vmul.f32 %v2274_v21, %v1156_v38  ;;  %2283 = vpow2.f32 %v624_v11  ;;  %v525_v38 = vmul.f32 %v2783_v62, %v2969_v22  ;;  %v637_v21 = vmul.f32 %v2772_v44, %v2969_v22 }
 0x415   :  { %1588 = vrot.lane.b32.xlu0 %v2879_v47, %s2355_s14  ;;  %2285 = vpow2.f32 %v500_v32  ;;  %v651_v44 = vmul.f32 %v2776_v50, %v2969_v22  ;;  %v665_v50 = vmul.f32 %v2781_v56, %v2969_v22 }
 0x416   :  { %1679 = vrot.lane.b32.xlu1 %v2836_v4, %s2355_s14  ;;  %2287 = vpow2.f32 %v638_v35  ;;  %v528_v25 = vmul.f32 1.442695, %v525_v38  ;;  %v692_v38 = vmul.f32 %v2793_v12, %v2889_v45 }
 0x417   :  { %v2964_v34 = vpop.permute.xlu1 %1090  ;;  %v2280_v43 = vpop.eup %2279  ;;  %2289 = vpow2.f32 %v514_v57  ;;  %v668_v46 = vmul.f32 1.442695, %v665_v50 }
 0x419   :  { %1600 = vrot.lane.b32.xlu0 %v1599_v41, %s2353_s4  ;;  %v640_v41 = vmul.f32 1.442695, %v637_v21  ;;  %v679_v21 = vmul.f32 %v2787_v51, %v2969_v22 }
 0x41a   :  { %1691 = vrot.lane.b32.xlu1 %v1690_v59, %s2353_s4  ;;  %v542_v59 = vmul.f32 1.442695, %v539_v54  ;;  %v567_v54 = vmul.f32 %v2802_v3, %v2969_v22  ;;  %v706_v3 = vmul.f32 %v2800_v39, %v2889_v45 }
 0x41b   :  { %v1175_v47 = vpop.permute.xlu0 %1174  ;;  %v2971_v33 = vpop.permute.xlu1 %1114 }
 0x41c   :  { %v1180_v4 = vadd.f32 %v1175_v47, %v1170_v20  ;;  %v2282_v14 = vpop.eup %2281  ;;  %v652_v20 = vmul.f32 1.442695, %v650_v36  ;;  %v666_v47 = vmul.f32 1.442695, %v664_v29 }
 0x41d   :  { %1787 = vrot.lane.b32.xlu0 %v1785_v49, %s2375_s19 }
 0x41e   :  { %v1194_v16 = vmul.f32 %v2278_v61, %v1180_v4  ;;  %2291 = vpow2.f32 %v652_v20  ;;  %v678_v61 = vmul.f32 %v2787_v51, %v2889_v45 }
 0x41f   :  { %v2980_v27 = vpop.permute.xlu1 %1138  ;;  %2293 = vpow2.f32 %v528_v25 }
 0x420   :  { %v1199_v17 = vpop.permute.xlu0 %1198  ;;  %2295 = vpow2.f32 %v640_v41 }
 0x421   :  { %v1204_v53 = vadd.f32 %v1199_v17, %v1194_v16  ;;  %v2284_v15 = vpop.eup %2283  ;;  %2297 = vpow2.f32 %v542_v59  ;;  %v654_v17 = vmul.f32 1.442695, %v651_v44 }
 0x422   :  { %v2286_v11 = vpop.eup %2285  ;;  %2299 = vpow2.f32 %v666_v47 }
 0x423   :  { %v1218_v48 = vmul.f32 %v2280_v43, %v1204_v53  ;;  %v2989_v8 = vpop.permute.xlu1 %1162  ;;  %v2288_v4 = vpop.eup %2287  ;;  %v1051_v63 = vmul.f32 0.0, %v2286_v11  ;;  %v553_v53 = vmul.f32 %v2795_v13, %v2969_v22  ;;  %2301 = vpow2.f32 %v654_v17 }
 0x424   :  { %v1223_v26 = vpop.permute.xlu0 %1222  ;;  %v1062_v43 = vmul.f32 0.0, %v2288_v4  ;;  %v2290_v24 = vpop.eup %2289  ;;  %v694_v11 = vmul.f32 1.442695, %v692_v38  ;;  %v570_v4 = vmul.f32 1.442695, %v567_v54 }
 0x425   :  { %v2975_v7 = vadd.f32 %v1223_v26, %v1218_v48 }
 0x426   :  { %v1072_v26 = vadd.f32 %v2953_v28, %v1062_v43 }
 0x427   :  { %v1404_v37 = vmul.f32 %v2282_v14, %v2975_v7  ;;  %v2999_v30 = vpop.permute.xlu1 %1186  ;;  %v680_v14 = vmul.f32 1.442695, %v678_v61 }
 0x429   :  { %2303 = vpow2.f32 %v680_v14  ;;  %v708_v14 = vmul.f32 1.442695, %v706_v3 }
 0x42a   :  { %v1409_v6 = vpop.permute.xlu0 %1408 }
 0x42b   :  { %v2982_v0 = vadd.f32 %v1409_v6, %v1404_v37  ;;  %v3003_v62 = vpop.permute.xlu1 %1210  ;;  %v556_v37 = vmul.f32 1.442695, %v553_v53  ;;  %v2292_v6 = vpop.eup %2291 }
 0x42c   :  { %v1086_v36 = vmul.f32 %v2292_v6, %v1072_v26 }
 0x42d   :  { %v2987_v31 = vmul.f32 %v2284_v15, %v2982_v0  ;;  %v2294_v15 = vpop.eup %2293  ;;  %2305 = vpow2.f32 %v556_v37 }
 0x42e   :  { %v2296_v28 = vpop.eup %2295  ;;  %2307 = vpow2.f32 %v668_v46  ;;  %v1096_v41 = vadd.f32 %v2964_v34, %v1086_v36  ;;  %v595_v36 = vmul.f32 %v2813_v23, %v2969_v22  ;;  %v734_v23 = vmul.f32 %v2811_v55, %v2889_v45 }
 0x42f   :  { %v3011_v48 = vpop.permute.xlu1 %1316  ;;  %v2298_v25 = vpop.eup %2297  ;;  %v1063_v44 = vmul.f32 0.0, %v2296_v28  ;;  %2309 = vpow2.f32 %v694_v11 }
 0x430   :  { %v2300_v47 = vpop.eup %2299 }
 0x431   :  { %v1110_v61 = vmul.f32 %v2300_v47, %v1096_v41  ;;  %v2302_v34 = vpop.eup %2301  ;;  %v721_v41 = vmul.f32 %v2806_v52, %v2969_v22 }
 0x433   :  { %v3016_v13 = vpop.permute.xlu1 %1497  ;;  %v1120_v43 = vadd.f32 %v2971_v33, %v1110_v61  ;;  %v720_v33 = vmul.f32 %v2806_v52, %v2889_v45  ;;  %v609_v52 = vmul.f32 %v2818_v9, %v2969_v22  ;;  %v749_v9 = vmul.f32 %v2816_v10, %v2969_v22 }
 0x435   :  { %v722_v28 = vmul.f32 1.442695, %v720_v33  ;;  %v623_v33 = vmul.f32 %v2823_v5, %v2969_v22 }
 0x439   :  { %v1057_v49 = vpop.permute.xlu0 %1056 }
 0x43a   :  { %v1061_v16 = vadd.f32 %v1057_v49, %v1051_v63  ;;  %v682_v49 = vmul.f32 1.442695, %v679_v21  ;;  %v581_v63 = vmul.f32 %v2808_v19, %v2969_v22  ;;  %v2304_v19 = vpop.eup %2303 }
 0x43b   :  { %v1134_v6 = vmul.f32 %v2304_v19, %v1120_v43  ;;  %v612_v19 = vmul.f32 1.442695, %v609_v52 }
 0x43c   :  { %v1075_v58 = vmul.f32 %v2290_v24, %v1061_v16  ;;  %v693_v16 = vmul.f32 %v2793_v12, %v2969_v22  ;;  %2311 = vpow2.f32 %v682_v49  ;;  %v584_v53 = vmul.f32 1.442695, %v581_v63 }
 0x43d   :  { %2313 = vpow2.f32 %v570_v4  ;;  %v707_v12 = vmul.f32 %v2800_v39, %v2969_v22  ;;  %v724_v4 = vmul.f32 1.442695, %v721_v41 }
 0x43e   :  { %v1069_v29 = vpop.permute.xlu1 %1068  ;;  %v696_v50 = vmul.f32 1.442695, %v693_v16  ;;  %2315 = vpow2.f32 %v584_v53 }
 0x43f   :  { %v1073_v51 = vadd.f32 %v1069_v29, %v1063_v44  ;;  %v710_v38 = vmul.f32 1.442695, %v707_v12  ;;  %v752_v12 = vmul.f32 1.442695, %v749_v9 }
 0x440   :  { %2317 = vpow2.f32 %v696_v50 }
 0x441   :  { %v1087_v24 = vmul.f32 %v2302_v34, %v1073_v51  ;;  %2319 = vpow2.f32 %v708_v14  ;;  %v735_v34 = vmul.f32 %v2811_v55, %v2969_v22 }
 0x442   :  { %2321 = vpow2.f32 %v710_v38 }
 0x443   :  { %v1081_v32 = vpop.permute.xlu0 %1080  ;;  %2323 = vpow2.f32 %v722_v28  ;;  %v738_v14 = vmul.f32 1.442695, %v735_v34  ;;  %v626_v28 = vmul.f32 1.442695, %v623_v33 }
 0x444   :  { %v1085_v35 = vadd.f32 %v1081_v32, %v1075_v58  ;;  %v2306_v32 = vpop.eup %2305 }
 0x446   :  { %v1099_v57 = vmul.f32 %v2294_v15, %v1085_v35  ;;  %v2308_v15 = vpop.eup %2307 }
 0x447   :  { %v1105_v56 = vpop.permute.xlu0 %1104  ;;  %v2310_v39 = vpop.eup %2309 }
 0x448   :  { %v1109_v20 = vadd.f32 %v1105_v56, %v1099_v57  ;;  %v1093_v17 = vpop.permute.xlu1 %1092  ;;  %v1144_v56 = vadd.f32 %v2980_v27, %v1134_v6 }
 0x449   :  { %v1097_v58 = vadd.f32 %v1093_v17, %v1087_v24  ;;  %v2312_v54 = vpop.eup %2311  ;;  %v736_v17 = vmul.f32 1.442695, %v734_v23 }
 0x44a   :  { %v1123_v59 = vmul.f32 %v2298_v25, %v1109_v20  ;;  %v598_v20 = vmul.f32 1.442695, %v595_v36  ;;  %v1158_v29 = vmul.f32 %v2310_v39, %v1144_v56  ;;  %v2314_v11 = vpop.eup %2313 }
 0x44b   :  { %v1111_v46 = vmul.f32 %v2308_v15, %v1097_v58  ;;  %v2316_v16 = vpop.eup %2315 }
 0x44c   :  { %2325 = vpow2.f32 %v598_v20  ;;  %v1168_v63 = vadd.f32 %v2989_v8, %v1158_v29  ;;  %v748_v8 = vmul.f32 %v2816_v10, %v2889_v45  ;;  %v763_v10 = vmul.f32 %v2821_v18, %v2969_v22 }
 0x44d   :  { %v1117_v57 = vpop.permute.xlu1 %1116  ;;  %v2318_v3 = vpop.eup %2317  ;;  %2327 = vpow2.f32 %v724_v4 }
 0x44e   :  { %v1121_v21 = vadd.f32 %v1117_v57, %v1111_v46  ;;  %v2320_v43 = vpop.eup %2319  ;;  %2329 = vpow2.f32 %v736_v17  ;;  %v766_v39 = vmul.f32 1.442695, %v763_v10 }
 0x44f   :  { %v1182_v50 = vmul.f32 %v2320_v43, %v1168_v63  ;;  %v2322_v55 = vpop.eup %2321  ;;  %2331 = vpow2.f32 %v612_v19 }
 0x450   :  { %v1135_v47 = vmul.f32 %v2312_v54, %v1121_v21  ;;  %2333 = vpow2.f32 %v738_v14  ;;  %v2324_v15 = vpop.eup %2323  ;;  %v762_v21 = vmul.f32 %v2821_v18, %v2889_v45  ;;  %v3213_v45 = vmov 0.0  }
 0x452   :  { %v1129_v26 = vpop.permute.xlu0 %1128  ;;  %v764_v29 = vmul.f32 1.442695, %v762_v21 }
 0x453   :  { %v1133_v37 = vadd.f32 %v1129_v26, %v1123_v59 }
 0x455   :  { %v1147_v35 = vmul.f32 %v2306_v32, %v1133_v37  ;;  %v1192_v37 = vadd.f32 %v2999_v30, %v1182_v50  ;;  %v750_v32 = vmul.f32 1.442695, %v748_v8 }
 0x457   :  { %v1141_v44 = vpop.permute.xlu1 %1140  ;;  %v1206_v38 = vmul.f32 %v2324_v15, %v1192_v37  ;;  %2335 = vpow2.f32 %v750_v32  ;;  %v1796_v37 = vld [vmem:[%s3186_s7 + $0x28] sm:$0xff]  ;;  %v1794_v32 = vld [vmem:[%s3186_s7 + $0x18] sm:$0xff] }
 0x458   :  { %v1145_v61 = vadd.f32 %v1141_v44, %v1135_v47  ;;  %2337 = vpow2.f32 %v752_v12  ;;  %v1793_v12 = vld [vmem:[%s3186_s7 + $0x10] sm:$0xff] }
 0x459   :  { %v2326_v57 = vpop.eup %2325  ;;  %v1216_v20 = vadd.f32 %v3003_v62, %v1206_v38  ;;  %2339 = vpow2.f32 %v626_v28 }
 0x45a   :  { %v1159_v26 = vmul.f32 %v2318_v3, %v1145_v61  ;;  %2341 = vpow2.f32 %v766_v39  ;;  %v3216_v39 = vld [vmem:[#allocation3_spill] sm:$0xff] }
 0x45b   :  { %2343 = vpow2.f32 %v764_v29 }
 0x45c   :  { %v1153_v25 = vpop.permute.xlu0 %1152 }
 0x45d   :  { %v1157_v59 = vadd.f32 %v1153_v25, %v1147_v35  ;;  %v2328_v25 = vpop.eup %2327 }
 0x45e   :  { %v2330_v41 = vpop.eup %2329 }
 0x45f   :  { %v1171_v27 = vmul.f32 %v2314_v11, %v1157_v59  ;;  %v1312_v22 = vmul.f32 %v2330_v41, %v1216_v20  ;;  %v2332_v23 = vpop.eup %2331 }
 0x460   :  { %v1177_v49 = vpop.permute.xlu0 %1176  ;;  %v2334_v47 = vpop.eup %2333 }
 0x461   :  { %v1181_v51 = vadd.f32 %v1177_v49, %v1171_v27  ;;  %v1165_v24 = vpop.permute.xlu1 %1164  ;;  %v1322_v18 = vadd.f32 %v3011_v48, %v1312_v22  ;;  %v3218_v22 = vld [vmem:[#allocation7_spill] sm:$0xff] }
 0x462   :  { %v1169_v58 = vadd.f32 %v1165_v24, %v1159_v26 }
 0x463   :  { %v1195_v53 = vmul.f32 %v2316_v16, %v1181_v51 }
 0x464   :  { %v1183_v6 = vmul.f32 %v2322_v55, %v1169_v58  ;;  %v2336_v4 = vpop.eup %2335  ;;  %v1797_v58 = vld [vmem:[%s3186_s7 + $0x30] sm:$0xff]  ;;  %v1795_v55 = vld [vmem:[%s3186_s7 + $0x20] sm:$0xff] }
 0x465   :  { %v2338_v61 = vpop.eup %2337  ;;  %v1493_v51 = vmul.f32 %v2336_v4, %v1322_v18 }
 0x466   :  { %v1189_v46 = vpop.permute.xlu1 %1188 }
 0x467   :  { %v1193_v56 = vadd.f32 %v1189_v46, %v1183_v6  ;;  %v1503_v34 = vadd.f32 %v3016_v13, %v1493_v51  ;;  %v1792_v6 = vld [vmem:[%s3186_s7 + $0x8] sm:$0xff] }
 0x469   :  { %v1207_v54 = vmul.f32 %v2328_v25, %v1193_v56  ;;  %v3215_v56 = vld [vmem:[#allocation6_spill] sm:$0xff] }
 0x46b   :  { %v1201_v35 = vpop.permute.xlu0 %1200 }
 0x46c   :  { %v1205_v36 = vadd.f32 %v1201_v35, %v1195_v53  ;;  %v1791_v35 = vld [vmem:[%s3186_s7] sm:$0xff] }
 0x46e   :  { %v1219_v30 = vmul.f32 %v2326_v57, %v1205_v36  ;;  %v3214_v57 = vld [vmem:[#allocation5_spill] sm:$0xff] }
 0x470   :  { %v1213_v5 = vpop.permute.xlu1 %1212 }
 0x471   :  { %v1217_v59 = vadd.f32 %v1213_v5, %v1207_v54  ;;  %v3217_v54 = vld [vmem:[#allocation4_spill] sm:$0xff] }
 0x473   :  { %v1313_v62 = vmul.f32 %v2334_v47, %v1217_v59 }
 0x475   :  { %v1225_v11 = vpop.permute.xlu0 %1224 }
 0x476   :  { %v1229_v44 = vadd.f32 %v1225_v11, %v1219_v30 }
 0x478   :  { %2093 = vmatpush3.msra.mxu1 %v1229_v44  ;;  %v1405_v27 = vmul.f32 %v2332_v23, %v1229_v44 }
 0x479   :  { %2094 = vmatprep.subr.mxu1 %v3213_v45 }
 0x47a   :  { %2095 = vmatpush3.msra.mxu1 %v2975_v7  ;;  %v1319_v49 = vpop.permute.xlu1 %1318 }
 0x47b   :  { %v1323_v63 = vadd.f32 %v1319_v49, %v1313_v62  ;;  %2097 = vmatmul.mubr.msk.f32.vlgmr.msra.gmra.mxu1 %vm1237_vm14, %v2728_v1  ;;  %2113 = vmatprep.subr.mxu1 %v3213_v45  ;;  %v2340_v1 = vpop.eup %2339  ;;  %v2348_v49 = vld [vmem:[%s3179_s0 + $0x8] sm:$0xff] }
 0x47c   :  { %2117 = vmatprep.mubr.msk.f32.mxu1 %vm2351_vm2, %v3213_v45  ;;  %v2342_v17 = vpop.eup %2341  ;;  %v1771_v4 = vrot.slane %v2348_v49, 7 }
 0x47d   :  { %2100 = vmatpush3.msra.mxu0 %v1323_v63  ;;  %v1494_v48 = vmul.f32 %v2338_v61, %v1323_v63  ;;  %v2344_v26 = vpop.eup %2343  ;;  %v2349_v63 = vld [vmem:[%s3179_s0 + $0x10] sm:$0xf] }
 0x47e   :  { %2101 = vmatprep.subr.mxu0 %v3213_v45  ;;  %v1500_v16 = vpop.permute.xlu1 %1499  ;;  %v1675_v19 = vmul.f32 %v2344_v26, %v1503_v34  ;;  %v1775_v61 = vrot.slane %v2349_v63, 6  ;;  %v1997_v26 = vld [vmem:[%s3181_s1 + $0x1] ss:$0 sm:$0xff] }
 0x47f   :  { %v1504_v52 = vadd.f32 %v1500_v16, %v1494_v48  ;;  %v1411_v7 = vpop.permute.xlu0 %1410  ;;  %2102 = vmatpush3.msra.mxu0 %v1322_v18  ;;  %v2347_v18 = vld [vmem:[%s3179_s0] sm:$0xff] }
 0x480   :  { %v1415_v3 = vadd.f32 %v1411_v7, %v1405_v27  ;;  %2104 = vmatmul.mubr.msk.f32.vlgmr.msra.gmra.mxu0 %vm1237_vm14, %v2761_v40  ;;  %2106 = vmatprep.subr.mxu0 %v3213_v45  ;;  %v1770_v62 = vrot.slane %v2347_v18, 7 }
 0x481   :  { %2114 = vmatpush3.msra.mxu1 %v1504_v52  ;;  %2110 = vmatprep.mubr.msk.f32.mxu0 %vm2351_vm2, %v3213_v45  ;;  %v1676_v24 = vmul.f32 %v2342_v17, %v1504_v52  ;;  %v1889_v17 = vld [vmem:[%s3187_s8 + $0x10] sm:$0xff] }
 0x482   :  { %2107 = vmatpush3.msra.mxu0 %v1415_v3  ;;  %2115 = vmatprep.subr.mxu1 %v3213_v45  ;;  %v1585_v53 = vmul.f32 %v2340_v1, %v1415_v3  ;;  %v1772_v51 = vsel %vm244_vm5, %v1770_v62, %v1771_v4 }
 0x483   :  { %v1591_v43 = vpop.permute.xlu0 %1590  ;;  %2108 = vmatprep.subr.mxu0 %v3213_v45  ;;  %2116 = vmatpush3.msra.mxu1 %v1503_v34  ;;  %v1777_v48 = vsel %vm181_vm3, %v1772_v51, %v1775_v61  ;;  %v1890_v34 = vld [vmem:[%s3187_s8 + $0x18] sm:$0xff] }
 0x484   :  { %v1595_v40 = vadd.f32 %v1591_v43, %v1585_v53  ;;  %2109 = vmatpush3.msra.mxu0 %v2982_v0  ;;  %2118 = vmatmul.mubr.msk.f32.vlgmr.msra.gmra.mxu1 %vm1237_vm14, %v2764_v42  ;;  %v1682_v13 = vpop.permute.xlu1 %1681  ;;  %v1888_v53 = vld [vmem:[%s3187_s8 + $0x8] sm:$0xff]  ;;  %v1887_v43 = vld [vmem:[%s3187_s8] sm:$0xff] }
 0x485   :  { %v1686_v50 = vadd.f32 %v1682_v13, %v1676_v24  ;;  %2111 = vmatmul.mubr.msk.f32.vlgmr.msra.gmra.mxu0 %vm1237_vm14, %v2730_v2  ;;  %2120 = vmatprep.subr.mxu0 %v3213_v45 }
 0x486   :  { %2121 = vmatpush3.msra.mxu0 %v1595_v40  ;;  %2127 = vmatprep.subr.mxu1 %v3213_v45 }
 0x487   :  { %v1589_v8 = vpop.permute.xlu0 %1588  ;;  %2128 = vmatpush3.msra.mxu1 %v1686_v50  ;;  %2122 = vmatprep.subr.mxu0 %v3213_v45 }
 0x488   :  { %v1594_v0 = vadd.f32 %v1589_v8, %v2987_v31  ;;  %v1680_v14 = vpop.permute.xlu1 %1679  ;;  %2129 = vmatprep.subr.mxu1 %v3213_v45  ;;  %2124 = vmatprep.mubr.msk.f32.mxu0 %vm2351_vm2, %v3213_v45  ;;  %v1798_v31 = vld [vmem:[%s3186_s7 + $0x38] sm:$0xff] }
 0x489   :  { %v1685_v2 = vadd.f32 %v1680_v14, %v1675_v19  ;;  %2131 = vmatprep.mubr.msk.f32.mxu1 %vm2351_vm2, %v3213_v45 }
 0x48a   :  { %2123 = vmatpush3.msra.mxu0 %v1594_v0  ;;  %v1998_v0 = vld [vmem:[%s3188_s9] ss:$0 sm:$0xff] }
 0x48b   :  { %v1601_v42 = vpop.permute.xlu0 %1600  ;;  %2130 = vmatpush3.msra.mxu1 %v1685_v2  ;;  %2134 = vmatprep.subr.mxu0 %v3213_v45 }
 0x48c   :  { %2125 = vmatmul.mubr.msk.f32.vlgmr.msra.gmra.mxu0 %vm1237_vm14, %v1601_v42  ;;  %v1692_v9 = vpop.permute.xlu1 %1691  ;;  %2153 = vmatprep.subr.mxu1 %v3213_v45 }
 0x48d   :  { %2132 = vmatmul.mubr.msk.f32.vlgmr.msra.gmra.mxu1 %vm1237_vm14, %v1692_v9  ;;  %2150 = vmatprep.mubr.msk.f32.mxu0 %vm2351_vm2, %v3213_v45 }
 0x48e   :  { %2161 = vmatprep.mubr.msk.f32.mxu1 %vm2351_vm2, %v3213_v45  ;;  %2135 = vmatpush3.msra.mxu0 %v1798_v31  ;;  %vm1971_vm2 = vcmask 13312  }
 0x48f   :  { %2136 = vmatprep.subr.mxu0 %v3213_v45  ;;  %v1788_v23 = vpop.permute.xlu0 %1787  ;;  %2154 = vmatpush3.msra.mxu1 %v1890_v34 }
 0x490   :  { %2137 = vmatpush3.msra.mxu0 %v1797_v58  ;;  %2155 = vmatprep.subr.mxu1 %v3213_v45 }
 0x491   :  { %2138 = vmatprep.subr.mxu0 %v3213_v45  ;;  %2156 = vmatpush3.msra.mxu1 %v1889_v17 }
 0x492   :  { %2139 = vmatpush3.msra.mxu0 %v1796_v37  ;;  %2157 = vmatprep.subr.mxu1 %v3213_v45 }
 0x493   :  { %2140 = vmatprep.subr.mxu0 %v3213_v45  ;;  %2158 = vmatpush3.msra.mxu1 %v1888_v53 }
 0x494   :  { %2141 = vmatpush3.msra.mxu0 %v1795_v55  ;;  %2159 = vmatprep.subr.mxu1 %v3213_v45 }
 0x495   :  { %2142 = vmatprep.subr.mxu0 %v3213_v45  ;;  %2160 = vmatpush3.msra.mxu1 %v1887_v43 }
 0x496   :  { %2143 = vmatpush3.msra.mxu0 %v1794_v32 }
 0x497   :  { %2144 = vmatprep.subr.mxu0 %v3213_v45 }
 0x498   :  { %2145 = vmatpush3.msra.mxu0 %v1793_v12 }
 0x499   :  { %2146 = vmatprep.subr.mxu0 %v3213_v45 }
 0x49a   :  { %2147 = vmatpush3.msra.mxu0 %v1792_v6 }
 0x49b   :  { %2148 = vmatprep.subr.mxu0 %v3213_v45 }
 0x49c   :  { %2149 = vmatpush3.msra.mxu0 %v1791_v35 }
 0x53b   :  { %v1306_v15 = vpop.f32.mrf.mxu1 }
 0x53c   :  { %v1307_v33 = vadd.f32 %v1306_v15, %v2571_v60 }
 0x53d   :  { %v2098_v46 = vpop.f32.mrf.mxu1 }
 0x53e   :  { %1311 = vst.msk [vmem:[#allocation2] sm:$0x1] %vm1310_vm15, %v1307_v33 }
 0x540   :  { %v1399_v36 = vpop.f32.mrf.mxu0 }
 0x541   :  { %v1400_v10 = vadd.f32 %v1399_v36, %v3214_v57 }
 0x542   :  { %v2105_v38 = vpop.f32.mrf.mxu0 }
 0x543   :  { %1403 = vst.msk [vmem:[#allocation2 + $0x3] sm:$0x1] %vm1310_vm15, %v1400_v10 }
 0x544   :  { %v1579_v30 = vpop.f32.mrf.mxu1 }
 0x545   :  { %v1580_v28 = vadd.f32 %v1579_v30, %v3215_v56  ;;  %v1488_v21 = vpop.f32.mrf.mxu0 }
 0x546   :  { %v1489_v20 = vadd.f32 %v1488_v21, %v3216_v39  ;;  %v2119_v25 = vpop.f32.mrf.mxu1 }
 0x547   :  { %1583 = vst.msk [vmem:[#allocation2 + $0x4] sm:$0x1] %vm1310_vm15, %v1580_v28  ;;  %v2112_v5 = vpop.f32.mrf.mxu0 }
 0x548   :  { %1492 = vst.msk [vmem:[#allocation2 + $0x1] sm:$0x1] %vm1310_vm15, %v1489_v20 }
 0x54c   :  { %v1670_v60 = vpop.f32.mrf.mxu0 }
 0x54d   :  { %v1671_v41 = vadd.f32 %v1670_v60, %v3217_v54  ;;  %v1761_v29 = vpop.f32.mrf.mxu1 }
 0x54e   :  { %v1762_v59 = vadd.f32 %v1761_v29, %v3218_v22  ;;  %v2126_v11 = vpop.f32.mrf.mxu0 }
 0x54f   :  { %1674 = vst.msk [vmem:[#allocation2 + $0x2] sm:$0x1] %vm1310_vm15, %v1671_v41  ;;  %v2133_v44 = vpop.f32.mrf.mxu1 }
 0x550   :  { %1765 = vst.msk [vmem:[#allocation2 + $0x5] sm:$0x1] %vm1310_vm15, %v1762_v59 }
 0x557   :  { %v1778_v47 = vld [vmem:[#allocation2] sm:$0x3f] }
 0x558   :  { %v1790_v27 = vmul.f32 %v1788_v23, %v1778_v47 }
 0x55a   :  { %2151 = vmatmul.mubr.msk.f32.vlgmr.msra.gmra.mxu0 %vm314_vm13, %v1790_v27 }
 0x61a   :  { %v1868_v16 = vpop.f32.mrf.mxu0 }
 0x61b   :  { %v1872_v52 = vadd.f32 %v1868_v16, %v1777_v48 }
 0x61c   :  { %v2152_v7 = vpop.f32.mrf.mxu0 }
 0x61d   :  { %v1873_v3 = vmul.f32 %v1872_v52, %v1872_v52 }
 0x61f   :  { %v1875_v1 = vsel %vm1874_vm1, %v1873_v3, 0.0 }
 0x620   :  { %1876 = vadd.xlane.f32.xlu1 %v1875_v1 }
 0x6a9   :  { %v1877_v24 = vpop.xlane.xlu1 %1876 }
 0x6aa   :  { %v1878_v40 = vmul.f32 0.03125, %v1877_v24 }
 0x6ac   :  { %v1879_v13 = vadd.f32 1e-05, %v1878_v40 }
 0x6ae   :  { %2345 = vrsqrt.f32 %v1879_v13 }
 0x6bb   :  { %v2346_v50 = vpop.eup %2345 }
 0x6bc   :  { %v1881_v8 = vmul.f32 %v2346_v50, %v1872_v52 }
 0x6be   :  { %v1886_v19 = vmul.f32 %v1997_v26, %v1881_v8 }
 0x6c0   :  { %2162 = vmatmul.mubr.msk.f32.vlgmr.msra.gmra.mxu1 %vm46_vm0, %v1886_v19 }
 0x780   :  { %v1967_v14 = vpop.f32.mrf.mxu1 }
 0x781   :  { %v1968_v45 = vadd.f32 %v1998_v0, %v1967_v14 }
 0x782   :  { %v2163_v2 = vpop.f32.mrf.mxu1 }
 0x783   :  { %1972 = vst.msk [vmem:[%s3189_s10] sm:$0x3f] %vm1971_vm2, %v1968_v45 }

</bundles_post_ra>
